<compile_context>
chip_gen: v7x
topology: tpu7x:2x2x1
jax: 0.10.0
libtpu: 0.0.40
codegen_flags: <defaults>
</compile_context>

<pallas_src>
import jax
import jax.numpy as jnp
from jax.experimental import pallas as pl
from jax.experimental.pallas import tpu as pltpu

NUM_INPUTS = 2   # candidate predecessor states
NUM_LAYER = 3
NUM_ACT = 3
NUM_CMB = 3
NUM_NORM = 2
LN_EPS = 1e-5

# offsets inside the packed SMEM architecture-weight array (matmul-path scalars are folded
# into the dense weights in the wrapper, so they do not appear here)
_OFF_LI, _OFF_RI = 0, 2        # left/right input mix        (2 each)
_OFF_LL1, _OFF_RL1 = 4, 5      # left/right layer identity-op weight (1 each)
_OFF_LA, _OFF_RA = 6, 9        # left/right activation mix   (3 each)
_OFF_CMB, _OFF_NRM = 12, 14    # combine add/mul (2), norm (2)
_AW_LEN = 16


def _kernel(aw_ref,                               # SMEM: packed architecture scalars
            x_ref, mask_ref,                      # VMEM tiles
            wdl_ref, bdl_ref, wdr_ref, bdr_ref,   # branch dense params (resident, pre-scaled)
            wcmb_ref, bcmb_ref,                   # combine dense params (resident, pre-scaled)
            o_ref):
    f32 = jnp.float32
    tile, C = o_ref.shape

    # mask hoisted & broadcast once per tile (used by both branches)
    mask = jnp.broadcast_to(mask_ref[...].astype(f32), (tile, C))

    # ---- input mixtures: sum_i w_i * x_i ----
    left_x = jnp.zeros((tile, C), f32)
    right_x = jnp.zeros((tile, C), f32)
    for i in range(NUM_INPUTS):
        xi = x_ref[i].astype(f32)
        left_x = left_x + aw_ref[_OFF_LI + i] * xi
        right_x = right_x + aw_ref[_OFF_RI + i] * xi

    def _mm(a, w_ref):
        w = w_ref[...]
        if w.dtype != f32:                 # bf16 MXU operands; weights pre-cast in wrapper
            a = a.astype(w.dtype)
        return jnp.dot(a, w, preferred_element_type=f32)

    # ---- layer-op mixtures: w0*zero + w1*(h*mask) + w2*(dense(h)*mask)
    #      zero-op contributes nothing; w2 is pre-folded into Wd/bd; mask factored out ----
    def layer_mix(h, w1_idx, wd_ref, bd_ref):
        dense = _mm(h, wd_ref) + bd_ref[...].astype(f32)
        return (aw_ref[w1_idx] * h + dense) * mask

    left_x = layer_mix(left_x, _OFF_LL1, wdl_ref, bdl_ref)
    right_x = layer_mix(right_x, _OFF_RL1, wdr_ref, bdr_ref)

    # ---- activation mixtures: identity / relu / tanh (tanh -> EUP, free slot) ----
    def act_mix(h, off):
        return (aw_ref[off] * h
                + aw_ref[off + 1] * jnp.maximum(h, 0.0)
                + aw_ref[off + 2] * jnp.tanh(h))

    left_x = act_mix(left_x, _OFF_LA)
    right_x = act_mix(right_x, _OFF_RA)

    # ---- combine mixture: add / mul / concat->dense (single K=2C dot, w2 pre-folded) ----
    lr = jnp.concatenate([left_x, right_x], axis=-1)          # (tile, 2C) lane concat
    cat_dense = _mm(lr, wcmb_ref) + bcmb_ref[...].astype(f32)
    h = (aw_ref[_OFF_CMB] * (left_x + right_x)
         + aw_ref[_OFF_CMB + 1] * (left_x * right_x)
         + cat_dense)

    # ---- norm mixture: layer_norm(no affine) / identity ----
    # NOTE: reduction over the full lane axis is exact because C is not lane-padded here.
    mu = jnp.mean(h, axis=-1, keepdims=True)
    var = jnp.mean((h - mu) ** 2, axis=-1, keepdims=True)
    ln = (h - mu) * jax.lax.rsqrt(var + LN_EPS)
    out = aw_ref[_OFF_NRM] * ln + aw_ref[_OFF_NRM + 1] * h

    o_ref[...] = out.astype(o_ref.dtype)


def _pick_tile(T, requested):
    """Token-tile with bounded zero-pad (< 8*n_steps rows).

    Single step for tiny T (single-TC v5e/v6e: per-step overhead ~0.35us dominates);
    >= 4 steps for large T so v7x's two TensorCores each get >= 2 overlapped steps.
    """
    requested = max(8, min(requested, T))
    n_steps = pl.cdiv(T, requested)
    if T >= 4 * 256:
        n_steps = max(n_steps, 4)
    tile = pl.cdiv(T, n_steps)
    tile = ((tile + 7) // 8) * 8          # round UP to sublane multiple
    T_pad = pl.cdiv(T, tile) * tile
    return tile, T_pad


def two_branch_op(x_stack, mask, weights, params, *, token_tile=1024, mxu_bf16=True):
    """x_stack: [NUM_INPUTS, T, C], mask: [T, 1] -> out: [T, C] (dtype follows x_stack)."""
    ni, T, C = x_stack.shape
    assert ni == NUM_INPUTS

    tile, T_pad = _pick_tile(T, token_tile)
    if T_pad != T:
        pad = T_pad - T
        x_stack = jnp.pad(x_stack, ((0, 0), (0, pad), (0, 0)))
        mask = jnp.pad(mask, ((0, pad), (0, 0)))     # zero mask on padded rows

    mask = mask.astype(x_stack.dtype)

    # pack the remaining small architecture scalars into a single SMEM array
    aw = jnp.concatenate([
        weights["left_input"], weights["right_input"],
        weights["left_layer"][1:2], weights["right_layer"][1:2],
        weights["left_activation"], weights["right_activation"],
        weights["combine_func"][:2], weights["norm"],
    ]).astype(jnp.float32)
    assert aw.shape[0] == _AW_LEN

    # fold matmul-path architecture scalars into the dense weights, pre-cast outside kernel
    f32 = jnp.float32
    w_dt = jnp.bfloat16 if mxu_bf16 else f32
    wl2 = weights["left_layer"][2].astype(f32)
    wr2 = weights["right_layer"][2].astype(f32)
    wc2 = weights["combine_func"][2].astype(f32)
    Wd_l = (params["Wd_l"].astype(f32) * wl2).astype(w_dt)
    bd_l = params["bd_l"].astype(f32) * wl2            # biases stay f32 (tiny, no repack)
    Wd_r = (params["Wd_r"].astype(f32) * wr2).astype(w_dt)
    bd_r = params["bd_r"].astype(f32) * wr2
    W_cmb = (params["W_cmb"].astype(f32) * wc2).astype(w_dt)
    b_cmb = params["b_cmb"].astype(f32) * wc2

    smem_spec = pl.BlockSpec(memory_space=pltpu.MemorySpace.SMEM)
    resident = lambda shape: pl.BlockSpec(shape, lambda t: (0,) * len(shape))

    grid = (T_pad // tile,)
    out = pl.pallas_call(
        _kernel,
        out_shape=jax.ShapeDtypeStruct((T_pad, C), x_stack.dtype),
        grid=grid,
        in_specs=[
            smem_spec,                                                  # packed arch scalars
            pl.BlockSpec((NUM_INPUTS, tile, C), lambda t: (0, t, 0)),   # x tile
            pl.BlockSpec((tile, 1), lambda t: (t, 0)),                  # mask tile
            resident((C, C)), resident((1, C)),                         # left branch dense
            resident((C, C)), resident((1, C)),                         # right branch dense
            resident((2 * C, C)), resident((1, C)),                     # combine dense
        ],
        out_specs=pl.BlockSpec((tile, C), lambda t: (t, 0)),
        compiler_params=pltpu.CompilerParams(
            dimension_semantics=("parallel",),      # shards grid steps across v7x's 2 TCs
            vmem_limit_bytes=32 * 1024 * 1024,      # safe on all gens (footprint ~2 MiB)
        ),
    )(aw, x_stack, mask, Wd_l, bd_l, Wd_r, bd_r, W_cmb, b_cmb)
    return out[:T] if T_pad != T else out


def two_branch_ref(x_stack, mask, w, p):
    """Pure-JAX reference mirroring the PyTorch forward with the same candidate ops."""
    x_stack = x_stack.astype(jnp.float32)
    mask = mask.astype(jnp.float32)

    def branch(inp_w, lay_w, act_w, Wd, bd):
        h = jnp.sum(x_stack * inp_w[:, None, None], axis=0)
        dense = h @ Wd + bd
        h = lay_w[0] * 0.0 + lay_w[1] * (h * mask) + lay_w[2] * (dense * mask)
        h = act_w[0] * h + act_w[1] * jax.nn.relu(h) + act_w[2] * jnp.tanh(h)
        return h

    l = branch(w["left_input"], w["left_layer"], w["left_activation"], p["Wd_l"], p["bd_l"])
    r = branch(w["right_input"], w["right_layer"], w["right_activation"], p["Wd_r"], p["bd_r"])
    cat = jnp.concatenate([l, r], axis=-1) @ p["W_cmb"] + p["b_cmb"]
    h = (w["combine_func"][0] * (l + r) + w["combine_func"][1] * (l * r)
         + w["combine_func"][2] * cat)
    mu = jnp.mean(h, axis=-1, keepdims=True)
    var = jnp.mean((h - mu) ** 2, axis=-1, keepdims=True)
    ln = (h - mu) / jnp.sqrt(var + LN_EPS)
    return w["norm"][0] * ln + w["norm"][1] * h


if __name__ == "__main__":
    key = jax.random.PRNGKey(0)
    # C = 128 -> lane-dense I/O (full 128-lane loads/stores, unmasked vst).
    B, S, C = 4, 16, 128
    T = B * S

    ks = jax.random.split(key, 16)

    # input states (two candidate predecessor states), tokens flattened
    x_stack = jax.random.normal(ks[0], (NUM_INPUTS, T, C), jnp.float32)

    # padding mask: last two tokens of each sequence padded out
    mask2d = jnp.ones((B, S), jnp.float32).at[:, -2:].set(0.0)
    mask = mask2d.reshape(T, 1)

    # architecture weights (softmaxed, as produced by the search controller)
    def arch_w(k, n):
        return jax.nn.softmax(jax.random.normal(k, (n,), jnp.float32))

    weights = {
        "left_input": arch_w(ks[1], NUM_INPUTS),
        "right_input": arch_w(ks[2], NUM_INPUTS),
        "left_layer": arch_w(ks[3], NUM_LAYER),
        "right_layer": arch_w(ks[4], NUM_LAYER),
        "left_activation": arch_w(ks[5], NUM_ACT),
        "right_activation": arch_w(ks[6], NUM_ACT),
        "combine_func": arch_w(ks[7], NUM_CMB),
        "norm": arch_w(ks[8], NUM_NORM),
    }

    # deterministic op parameters
    params = {
        "Wd_l": jax.random.normal(ks[9], (C, C), jnp.float32) / jnp.sqrt(C),
        "bd_l": jax.random.normal(ks[10], (1, C), jnp.float32) * 0.01,
        "Wd_r": jax.random.normal(ks[11], (C, C), jnp.float32) / jnp.sqrt(C),
        "bd_r": jax.random.normal(ks[12], (1, C), jnp.float32) * 0.01,
        "W_cmb": jax.random.normal(ks[13], (2 * C, C), jnp.float32) / jnp.sqrt(2 * C),
        "b_cmb": jax.random.normal(ks[14], (1, C), jnp.float32) * 0.01,
    }

    ref = two_branch_ref(x_stack, mask, weights, params)

    # --- default hot path: bf16 HBM I/O + bf16 MXU operands (weights pre-cast in wrapper)
    out_bf16 = two_branch_op(x_stack.astype(jnp.bfloat16), mask, weights, params)
    out_bf16 = jax.block_until_ready(out_bf16)
    assert out_bf16.shape == (T, C) and out_bf16.dtype == jnp.bfloat16
    abs_err = jnp.abs(out_bf16.astype(jnp.float32) - ref)
    rel_err = abs_err / (jnp.abs(ref) + 0.1)
    assert float(jnp.max(abs_err)) < 0.15, "bf16 path abs error too large"
    assert float(jnp.max(rel_err)) < 0.15, "bf16 path relative error too large"

    # --- bf16 path again with an awkward T to exercise the bounded-pad tile picker
    T_odd = T - 3
    out_odd = two_branch_op(x_stack[:, :T_odd].astype(jnp.bfloat16), mask[:T_odd],
                            weights, params)
    out_odd = jax.block_until_ready(out_odd)
    assert out_odd.shape == (T_odd, C)
    odd_err = jnp.abs(out_odd.astype(jnp.float32) - ref[:T_odd])
    assert float(jnp.max(odd_err)) < 0.15, "padded-T path diverged from reference"

    # --- f32 debug path (tolerance covers MXU f32 pass differences vs XLA reference)
    out_f32 = two_branch_op(x_stack, mask, weights, params, mxu_bf16=False)
    out_f32 = jax.block_until_ready(out_f32)
    assert out_f32.shape == (T, C) and out_f32.dtype == jnp.float32
    assert jnp.allclose(out_f32, ref, atol=2e-2, rtol=2e-2), "f32 path mismatch vs reference"

    print("KERNEL_OK")
</pallas_src>

<mosaic_0001>
module attributes {stable_mosaic.version = 11 : i64} {
  func.func @_kernel(%arg0: i32, %arg1: memref<16xf32, #tpu.memory_space<smem>>, %arg2: memref<2x64x128xbf16, #tpu.memory_space<vmem>>, %arg3: memref<64x1xbf16, #tpu.memory_space<vmem>>, %arg4: memref<128x128xbf16, #tpu.memory_space<vmem>>, %arg5: memref<1x128xf32, #tpu.memory_space<vmem>>, %arg6: memref<128x128xbf16, #tpu.memory_space<vmem>>, %arg7: memref<1x128xf32, #tpu.memory_space<vmem>>, %arg8: memref<256x128xbf16, #tpu.memory_space<vmem>>, %arg9: memref<1x128xf32, #tpu.memory_space<vmem>>, %arg10: memref<64x128xbf16, #tpu.memory_space<vmem>>) attributes {dimension_semantics = [#tpu.dimension_semantics<parallel>], iteration_bounds = array<i64: 1>, scalar_prefetch = 0 : i64, scratch_operands = 0 : i64, tpu.core_type = #tpu.core_type<tc>, window_params = [{transform_indices = @transform_0, window_bounds = array<i64: 16>}, {transform_indices = @transform_1, window_bounds = array<i64: 2, 64, 128>}, {transform_indices = @transform_2, window_bounds = array<i64: 64, 1>}, {pipeline_mode = #tpu.pipeline_mode<synchronous>, transform_indices = @transform_3, window_bounds = array<i64: 128, 128>}, {pipeline_mode = #tpu.pipeline_mode<synchronous>, transform_indices = @transform_4, window_bounds = array<i64: 1, 128>}, {pipeline_mode = #tpu.pipeline_mode<synchronous>, transform_indices = @transform_5, window_bounds = array<i64: 128, 128>}, {pipeline_mode = #tpu.pipeline_mode<synchronous>, transform_indices = @transform_6, window_bounds = array<i64: 1, 128>}, {pipeline_mode = #tpu.pipeline_mode<synchronous>, transform_indices = @transform_7, window_bounds = array<i64: 256, 128>}, {pipeline_mode = #tpu.pipeline_mode<synchronous>, transform_indices = @transform_8, window_bounds = array<i64: 1, 128>}, {transform_indices = @transform_9, window_bounds = array<i64: 64, 128>}]} {
    %c0 = arith.constant 0 : index
    %c0_0 = arith.constant 0 : index
    %0 = vector.load %arg3[%c0, %c0_0] : memref<64x1xbf16, #tpu.memory_space<vmem>>, vector<64x1xbf16>
    %1 = arith.extf %0 : vector<64x1xbf16> to vector<64x1xf32>
    %2 = vector.shape_cast %1 : vector<64x1xf32> to vector<64x1xf32>
    %3 = vector.broadcast %2 : vector<64x1xf32> to vector<64x128xf32>
    %cst = arith.constant 0.000000e+00 : f32
    %4 = vector.broadcast %cst : f32 to vector<64x128xf32>
    %cst_1 = arith.constant 0.000000e+00 : f32
    %5 = vector.broadcast %cst_1 : f32 to vector<64x128xf32>
    %c0_2 = arith.constant 0 : index
    %c0_3 = arith.constant 0 : index
    %c0_4 = arith.constant 0 : index
    %6 = vector.load %arg2[%c0_2, %c0_3, %c0_4] : memref<2x64x128xbf16, #tpu.memory_space<vmem>>, vector<1x64x128xbf16>
    %7 = vector.shape_cast %6 : vector<1x64x128xbf16> to vector<64x128xbf16>
    %8 = arith.extf %7 : vector<64x128xbf16> to vector<64x128xf32>
    %c0_5 = arith.constant 0 : index
    %9 = memref.load %arg1[%c0_5] : memref<16xf32, #tpu.memory_space<smem>>
    %10 = vector.broadcast %9 : f32 to vector<64x128xf32>
    %11 = arith.mulf %10, %8 : vector<64x128xf32>
    %12 = arith.addf %4, %11 : vector<64x128xf32>
    %c2 = arith.constant 2 : index
    %13 = memref.load %arg1[%c2] : memref<16xf32, #tpu.memory_space<smem>>
    %14 = vector.broadcast %13 : f32 to vector<64x128xf32>
    %15 = arith.mulf %14, %8 : vector<64x128xf32>
    %16 = arith.addf %5, %15 : vector<64x128xf32>
    %c1 = arith.constant 1 : index
    %c0_6 = arith.constant 0 : index
    %c0_7 = arith.constant 0 : index
    %17 = vector.load %arg2[%c1, %c0_6, %c0_7] : memref<2x64x128xbf16, #tpu.memory_space<vmem>>, vector<1x64x128xbf16>
    %18 = vector.shape_cast %17 : vector<1x64x128xbf16> to vector<64x128xbf16>
    %19 = arith.extf %18 : vector<64x128xbf16> to vector<64x128xf32>
    %c1_8 = arith.constant 1 : index
    %20 = memref.load %arg1[%c1_8] : memref<16xf32, #tpu.memory_space<smem>>
    %21 = vector.broadcast %20 : f32 to vector<64x128xf32>
    %22 = arith.mulf %21, %19 : vector<64x128xf32>
    %23 = arith.addf %12, %22 : vector<64x128xf32>
    %c3 = arith.constant 3 : index
    %24 = memref.load %arg1[%c3] : memref<16xf32, #tpu.memory_space<smem>>
    %25 = vector.broadcast %24 : f32 to vector<64x128xf32>
    %26 = arith.mulf %25, %19 : vector<64x128xf32>
    %27 = arith.addf %16, %26 : vector<64x128xf32>
    %c0_9 = arith.constant 0 : index
    %c0_10 = arith.constant 0 : index
    %28 = vector.load %arg4[%c0_9, %c0_10] : memref<128x128xbf16, #tpu.memory_space<vmem>>, vector<128x128xbf16>
    %29 = arith.truncf %23 : vector<64x128xf32> to vector<64x128xbf16>
    %cst_11 = arith.constant dense<0.000000e+00> : vector<64x128xf32>
    %30 = tpu.matmul %29, %28, %cst_11 {dimension_numbers = #tpu.dot_dimension_numbers<[1], [0], [0], [1], [0, 0, 1, 1], [], []>} : vector<64x128xbf16>, vector<128x128xbf16>, vector<64x128xf32> -> vector<64x128xf32>
    %c0_12 = arith.constant 0 : index
    %c0_13 = arith.constant 0 : index
    %31 = vector.load %arg5[%c0_12, %c0_13] : memref<1x128xf32, #tpu.memory_space<vmem>>, vector<1x128xf32>
    %32 = vector.broadcast %31 : vector<1x128xf32> to vector<64x128xf32>
    %33 = arith.addf %30, %32 : vector<64x128xf32>
    %c4 = arith.constant 4 : index
    %34 = memref.load %arg1[%c4] : memref<16xf32, #tpu.memory_space<smem>>
    %35 = vector.broadcast %34 : f32 to vector<64x128xf32>
    %36 = arith.mulf %35, %23 : vector<64x128xf32>
    %37 = arith.addf %36, %33 : vector<64x128xf32>
    %38 = arith.mulf %37, %3 : vector<64x128xf32>
    %c0_14 = arith.constant 0 : index
    %c0_15 = arith.constant 0 : index
    %39 = vector.load %arg6[%c0_14, %c0_15] : memref<128x128xbf16, #tpu.memory_space<vmem>>, vector<128x128xbf16>
    %40 = arith.truncf %27 : vector<64x128xf32> to vector<64x128xbf16>
    %cst_16 = arith.constant dense<0.000000e+00> : vector<64x128xf32>
    %41 = tpu.matmul %40, %39, %cst_16 {dimension_numbers = #tpu.dot_dimension_numbers<[1], [0], [0], [1], [0, 0, 1, 1], [], []>} : vector<64x128xbf16>, vector<128x128xbf16>, vector<64x128xf32> -> vector<64x128xf32>
    %c0_17 = arith.constant 0 : index
    %c0_18 = arith.constant 0 : index
    %42 = vector.load %arg7[%c0_17, %c0_18] : memref<1x128xf32, #tpu.memory_space<vmem>>, vector<1x128xf32>
    %43 = vector.broadcast %42 : vector<1x128xf32> to vector<64x128xf32>
    %44 = arith.addf %41, %43 : vector<64x128xf32>
    %c5 = arith.constant 5 : index
    %45 = memref.load %arg1[%c5] : memref<16xf32, #tpu.memory_space<smem>>
    %46 = vector.broadcast %45 : f32 to vector<64x128xf32>
    %47 = arith.mulf %46, %27 : vector<64x128xf32>
    %48 = arith.addf %47, %44 : vector<64x128xf32>
    %49 = arith.mulf %48, %3 : vector<64x128xf32>
    %c6 = arith.constant 6 : index
    %50 = memref.load %arg1[%c6] : memref<16xf32, #tpu.memory_space<smem>>
    %51 = vector.broadcast %50 : f32 to vector<64x128xf32>
    %52 = arith.mulf %51, %38 : vector<64x128xf32>
    %c7 = arith.constant 7 : index
    %53 = memref.load %arg1[%c7] : memref<16xf32, #tpu.memory_space<smem>>
    %cst_19 = arith.constant 0.000000e+00 : f32
    %54 = vector.broadcast %cst_19 : f32 to vector<64x128xf32>
    %55 = arith.maximumf %38, %54 : vector<64x128xf32>
    %56 = vector.broadcast %53 : f32 to vector<64x128xf32>
    %57 = arith.mulf %56, %55 : vector<64x128xf32>
    %58 = arith.addf %52, %57 : vector<64x128xf32>
    %c8 = arith.constant 8 : index
    %59 = memref.load %arg1[%c8] : memref<16xf32, #tpu.memory_space<smem>>
    %60 = math.tanh %38 : vector<64x128xf32>
    %61 = vector.broadcast %59 : f32 to vector<64x128xf32>
    %62 = arith.mulf %61, %60 : vector<64x128xf32>
    %63 = arith.addf %58, %62 : vector<64x128xf32>
    %c9 = arith.constant 9 : index
    %64 = memref.load %arg1[%c9] : memref<16xf32, #tpu.memory_space<smem>>
    %65 = vector.broadcast %64 : f32 to vector<64x128xf32>
    %66 = arith.mulf %65, %49 : vector<64x128xf32>
    %c10 = arith.constant 10 : index
    %67 = memref.load %arg1[%c10] : memref<16xf32, #tpu.memory_space<smem>>
    %cst_20 = arith.constant 0.000000e+00 : f32
    %68 = vector.broadcast %cst_20 : f32 to vector<64x128xf32>
    %69 = arith.maximumf %49, %68 : vector<64x128xf32>
    %70 = vector.broadcast %67 : f32 to vector<64x128xf32>
    %71 = arith.mulf %70, %69 : vector<64x128xf32>
    %72 = arith.addf %66, %71 : vector<64x128xf32>
    %c11 = arith.constant 11 : index
    %73 = memref.load %arg1[%c11] : memref<16xf32, #tpu.memory_space<smem>>
    %74 = math.tanh %49 : vector<64x128xf32>
    %75 = vector.broadcast %73 : f32 to vector<64x128xf32>
    %76 = arith.mulf %75, %74 : vector<64x128xf32>
    %77 = arith.addf %72, %76 : vector<64x128xf32>
    %78 = tpu.concatenate %63, %77 in 1 : vector<64x128xf32>, vector<64x128xf32> -> vector<64x256xf32>
    %c0_21 = arith.constant 0 : index
    %c0_22 = arith.constant 0 : index
    %79 = vector.load %arg8[%c0_21, %c0_22] : memref<256x128xbf16, #tpu.memory_space<vmem>>, vector<256x128xbf16>
    %80 = arith.truncf %78 : vector<64x256xf32> to vector<64x256xbf16>
    %cst_23 = arith.constant dense<0.000000e+00> : vector<64x128xf32>
    %81 = tpu.matmul %80, %79, %cst_23 {dimension_numbers = #tpu.dot_dimension_numbers<[1], [0], [0], [1], [0, 0, 1, 1], [], []>} : vector<64x256xbf16>, vector<256x128xbf16>, vector<64x128xf32> -> vector<64x128xf32>
    %c0_24 = arith.constant 0 : index
    %c0_25 = arith.constant 0 : index
    %82 = vector.load %arg9[%c0_24, %c0_25] : memref<1x128xf32, #tpu.memory_space<vmem>>, vector<1x128xf32>
    %83 = vector.broadcast %82 : vector<1x128xf32> to vector<64x128xf32>
    %84 = arith.addf %81, %83 : vector<64x128xf32>
    %c12 = arith.constant 12 : index
    %85 = memref.load %arg1[%c12] : memref<16xf32, #tpu.memory_space<smem>>
    %86 = arith.addf %63, %77 : vector<64x128xf32>
    %87 = vector.broadcast %85 : f32 to vector<64x128xf32>
    %88 = arith.mulf %87, %86 : vector<64x128xf32>
    %c13 = arith.constant 13 : index
    %89 = memref.load %arg1[%c13] : memref<16xf32, #tpu.memory_space<smem>>
    %90 = arith.mulf %63, %77 : vector<64x128xf32>
    %91 = vector.broadcast %89 : f32 to vector<64x128xf32>
    %92 = arith.mulf %91, %90 : vector<64x128xf32>
    %93 = arith.addf %88, %92 : vector<64x128xf32>
    %94 = arith.addf %93, %84 : vector<64x128xf32>
    %cst_26 = arith.constant dense<0.000000e+00> : vector<64xf32>
    %95 = vector.multi_reduction <add>, %94, %cst_26 [1] : vector<64x128xf32> to vector<64xf32>
    %96 = vector.shape_cast %95 : vector<64xf32> to vector<64x1xf32>
    %cst_27 = arith.constant 1.280000e+02 : f32
    %97 = vector.broadcast %cst_27 : f32 to vector<64x1xf32>
    %98 = arith.divf %96, %97 : vector<64x1xf32>
    %99 = vector.broadcast %98 : vector<64x1xf32> to vector<64x128xf32>
    %100 = arith.subf %94, %99 : vector<64x128xf32>
    %101 = arith.mulf %100, %100 : vector<64x128xf32>
    %cst_28 = arith.constant dense<0.000000e+00> : vector<64xf32>
    %102 = vector.multi_reduction <add>, %101, %cst_28 [1] : vector<64x128xf32> to vector<64xf32>
    %103 = vector.shape_cast %102 : vector<64xf32> to vector<64x1xf32>
    %cst_29 = arith.constant 1.280000e+02 : f32
    %104 = vector.broadcast %cst_29 : f32 to vector<64x1xf32>
    %105 = arith.divf %103, %104 : vector<64x1xf32>
    %106 = vector.broadcast %98 : vector<64x1xf32> to vector<64x128xf32>
    %107 = arith.subf %94, %106 : vector<64x128xf32>
    %cst_30 = arith.constant 9.99999974E-6 : f32
    %108 = vector.broadcast %cst_30 : f32 to vector<64x1xf32>
    %109 = arith.addf %105, %108 : vector<64x1xf32>
    %110 = math.rsqrt %109 : vector<64x1xf32>
    %111 = vector.broadcast %110 : vector<64x1xf32> to vector<64x128xf32>
    %112 = arith.mulf %107, %111 : vector<64x128xf32>
    %c14 = arith.constant 14 : index
    %113 = memref.load %arg1[%c14] : memref<16xf32, #tpu.memory_space<smem>>
    %114 = vector.broadcast %113 : f32 to vector<64x128xf32>
    %115 = arith.mulf %114, %112 : vector<64x128xf32>
    %c15 = arith.constant 15 : index
    %116 = memref.load %arg1[%c15] : memref<16xf32, #tpu.memory_space<smem>>
    %117 = vector.broadcast %116 : f32 to vector<64x128xf32>
    %118 = arith.mulf %117, %94 : vector<64x128xf32>
    %119 = arith.addf %115, %118 : vector<64x128xf32>
    %120 = arith.truncf %119 : vector<64x128xf32> to vector<64x128xbf16>
    %c0_31 = arith.constant 0 : index
    %c0_32 = arith.constant 0 : index
    %121 = vector.load %arg10[%c0_31, %c0_32] : memref<64x128xbf16, #tpu.memory_space<vmem>>, vector<64x128xbf16>
    tpu.vector_store %arg10[%c0_31, %c0_32], %120 {strides = array<i32>} : memref<64x128xbf16, #tpu.memory_space<vmem>>, vector<64x128xbf16>,
    return
  }
  func.func @transform_0(%arg0: i32) -> i32 {
    %c0_i32 = arith.constant 0 : i32
    %c0_i32_0 = arith.constant 0 : i32
    return %c0_i32 : i32
  }
  func.func @transform_1(%arg0: i32) -> (i32, i32, i32) {
    %c0_i32 = arith.constant 0 : i32
    %c0_i32_0 = arith.constant 0 : i32
    %c0_i32_1 = arith.constant 0 : i32
    return %c0_i32, %arg0, %c0_i32_0 : i32, i32, i32
  }
  func.func @transform_2(%arg0: i32) -> (i32, i32) {
    %c0_i32 = arith.constant 0 : i32
    %c0_i32_0 = arith.constant 0 : i32
    return %arg0, %c0_i32 : i32, i32
  }
  func.func @transform_3(%arg0: i32) -> (i32, i32) {
    %c0_i32 = arith.constant 0 : i32
    %c0_i32_0 = arith.constant 0 : i32
    %c0_i32_1 = arith.constant 0 : i32
    return %c0_i32, %c0_i32_0 : i32, i32
  }
  func.func @transform_4(%arg0: i32) -> (i32, i32) {
    %c0_i32 = arith.constant 0 : i32
    %c0_i32_0 = arith.constant 0 : i32
    %c0_i32_1 = arith.constant 0 : i32
    return %c0_i32, %c0_i32_0 : i32, i32
  }
  func.func @transform_5(%arg0: i32) -> (i32, i32) {
    %c0_i32 = arith.constant 0 : i32
    %c0_i32_0 = arith.constant 0 : i32
    %c0_i32_1 = arith.constant 0 : i32
    return %c0_i32, %c0_i32_0 : i32, i32
  }
  func.func @transform_6(%arg0: i32) -> (i32, i32) {
    %c0_i32 = arith.constant 0 : i32
    %c0_i32_0 = arith.constant 0 : i32
    %c0_i32_1 = arith.constant 0 : i32
    return %c0_i32, %c0_i32_0 : i32, i32
  }
  func.func @transform_7(%arg0: i32) -> (i32, i32) {
    %c0_i32 = arith.constant 0 : i32
    %c0_i32_0 = arith.constant 0 : i32
    %c0_i32_1 = arith.constant 0 : i32
    return %c0_i32, %c0_i32_0 : i32, i32
  }
  func.func @transform_8(%arg0: i32) -> (i32, i32) {
    %c0_i32 = arith.constant 0 : i32
    %c0_i32_0 = arith.constant 0 : i32
    %c0_i32_1 = arith.constant 0 : i32
    return %c0_i32, %c0_i32_0 : i32, i32
  }
  func.func @transform_9(%arg0: i32) -> (i32, i32) {
    %c0_i32 = arith.constant 0 : i32
    %c0_i32_0 = arith.constant 0 : i32
    return %arg0, %c0_i32 : i32, i32
  }
}

</mosaic_0001>

<bundles_post_ra>
// kernel: tpu_custom_call.1
= control target key start
LH: loop header
LB: loop body
LE: loop exit
PB: predicated region body
PF: predicated region fallthrough
CT: control target
= control target key end

     0   :  { %14 = vsyncpa [#allocation5], 0  ;;  %s2267_s0 = inlined_call_operand.vmem [shape: f32[16], index: 0, kind: input, shape index: {}]   ;;  %s2268_s1 = inlined_call_operand.hbm [shape: bf16[2,64,128], index: 1, kind: input, shape index: {}]   ;;  %s2269_s2 = inlined_call_operand.vmem [shape: bf16[64,1], index: 2, kind: input, shape index: {}]   ;;  %s2270_s3 = inlined_call_operand.hbm [shape: bf16[128,128], index: 3, kind: input, shape index: {}]   ;;  %s2271_s4 = inlined_call_operand.vmem [shape: f32[1,128], index: 4, kind: input, shape index: {}]   ;;  %s2272_s5 = inlined_call_operand.hbm [shape: bf16[128,128], index: 5, kind: input, shape index: {}]   ;;  %s2273_s6 = inlined_call_operand.vmem [shape: f32[1,128], index: 6, kind: input, shape index: {}]   ;;  %s2274_s7 = inlined_call_operand.hbm [shape: bf16[256,128], index: 7, kind: input, shape index: {}]   ;;  %s2275_s8 = inlined_call_operand.vmem [shape: f32[1,128], index: 8, kind: input, shape index: {}]   ;;  %s2276_s9 = inlined_call_operand.hbm [shape: bf16[64,128], index: 9, kind: output, shape index: {}]  }
   0x1   :  { %15 = vsyncpa [#allocation3], 0 }
   0x2   :  { %16 = vsyncpa [#allocation8], 0 }
   0x3   :  { %17 = vsyncpa [#allocation11], 0 }
   0x4   :  { %18 = vsyncpa [#allocation4], 0  ;;  %s25_s11 = sshll.u32 %s2267_s0, 4  ;;  %s1657_s12 = smov [#allocation7]   ;;  %s26_s11 = int_to_ptr.vmem [resolvable:$true] %s25_s11 }
   0x5   :  { %s48_s13 = sshll.u32 %s1657_s12, 4  ;;  %s1525_s16 = scalar_lea.hbm %s2270_s3, 1024  ;;  %s49_s13 = int_to_ptr.vmem [resolvable:$true] %s48_s13 }
   0x6   :  { %p1526_p0 = scmp.ne.s32.totalorder %s2270_s3, %s1525_s16  ;;  %p1529_p1 = scmp.lt.u32.totalorder %s1525_s16, %s2270_s3 }
   0x8   :  { %p1531_p2 = pnand %p1529_p1, %p1526_p0 }
   0xa   :  { %1534 = shalt.err (!%p1531_p2)
}
   0xb   :  { %s1535_s21 = scalar_lea.vmem %s49_s13, 1024  ;;  %p1540_p4 = scmp.lt.s32.totalorder %s49_s13, %s49_s13 }
   0xc   :  { %p1536_p3 = scmp.ne.s32.totalorder %s49_s13, %s1535_s21  ;;  %p1541_p5 = scmp.lt.s32.totalorder %s1535_s21, %s1535_s21 }
   0xe   :  { %p1542_p6 = por %p1541_p5, %p1540_p4 }
  0x10   :  { %p1543_p7 = pnand %p1542_p6, %p1536_p3 }
  0x12   :  { %1546 = shalt.err (!%p1543_p7)
}
  0x13   :  { %s1658_s0 = smov 64   ;;  %s1659_s22 = smov 4  }
  0x14   :  { %54 = dma.hbm_to_vmem [thread:$0]  %s2270_s3, 1024, %s49_s13, [#allocation8], %s1658_s0, %s1658_s0, %s1659_s22  }
  0x15   :  { %s1547_s25 = scalar_lea.vmem %s26_s11, 16  ;;  %p1552_p9 = scmp.lt.s32.totalorder %s26_s11, %s26_s11 }
  0x16   :  { %p1548_p8 = scmp.ne.s32.totalorder %s26_s11, %s1547_s25  ;;  %p1553_p10 = scmp.lt.s32.totalorder %s1547_s25, %s1547_s25 }
  0x18   :  { %p1554_p11 = por %p1553_p10, %p1552_p9 }
  0x1a   :  { %p1555_p12 = pnand %p1554_p11, %p1548_p8 }
  0x1c   :  { %1558 = shalt.err (!%p1555_p12)
}
  0x1d   :  { %s1660_s26 = smov [#allocation2]   ;;  %s1661_s27 = smov [#allocation6]  }
  0x1e   :  { %28 = dma.vmem_to_smem %s26_s11, 16, %s1660_s26, [#allocation5]  }
  0x1f   :  { %s34_s28 = sshll.u32 %s1661_s27, 4  ;;  %s1662_s29 = smov [#allocation9]   ;;  %s35_s28 = int_to_ptr.vmem [resolvable:$true] %s34_s28 }
  0x20   :  { %s62_s30 = sshll.u32 %s1662_s29, 4  ;;  %s1559_s3 = scalar_lea.hbm %s2268_s1, 1024  ;;  %s1734_s30 = int_to_ptr.vmem [resolvable:$true] %s62_s30 }
  0x21   :  { %p1560_p13 = scmp.ne.s32.totalorder %s2268_s1, %s1559_s3  ;;  %p1563_p0 = scmp.lt.u32.totalorder %s1559_s3, %s2268_s1 }
  0x23   :  { %p1565_p1 = pnand %p1563_p0, %p1560_p13 }
  0x25   :  { %1568 = shalt.err (!%p1565_p1)
}
  0x26   :  { %s1569_s11 = scalar_lea.vmem %s35_s28, 1024  ;;  %p1574_p3 = scmp.lt.s32.totalorder %s35_s28, %s35_s28 }
  0x27   :  { %p1570_p2 = scmp.ne.s32.totalorder %s35_s28, %s1569_s11  ;;  %p1575_p4 = scmp.lt.s32.totalorder %s1569_s11, %s1569_s11 }
  0x29   :  { %p1576_p5 = por %p1575_p4, %p1574_p3 }
  0x2b   :  { %p1577_p6 = pnand %p1576_p5, %p1570_p2 }
  0x2d   :  { %1580 = shalt.err (!%p1577_p6)
}
  0x2e   :  { %40 = dma.hbm_to_vmem [thread:$0]  %s2268_s1, 1024, %s35_s28, [#allocation3], %s1658_s0, %s1658_s0, %s1659_s22  }
  0x2f   :  { %s1581_s21 = scalar_lea.hbm %s2272_s5, 1024 }
  0x30   :  { %p1582_p7 = scmp.ne.s32.totalorder %s2272_s5, %s1581_s21  ;;  %p1585_p8 = scmp.lt.u32.totalorder %s1581_s21, %s2272_s5 }
  0x32   :  { %p1587_p9 = pnand %p1585_p8, %p1582_p7 }
  0x34   :  { %1590 = shalt.err (!%p1587_p9)
}
  0x35   :  { %s1591_s27 = scalar_lea.vmem %s1734_s30, 1024  ;;  %p1596_p11 = scmp.lt.s32.totalorder %s1734_s30, %s1734_s30 }
  0x36   :  { %p1592_p10 = scmp.ne.s32.totalorder %s1734_s30, %s1591_s27  ;;  %p1597_p12 = scmp.lt.s32.totalorder %s1591_s27, %s1591_s27 }
  0x38   :  { %p1598_p13 = por %p1597_p12, %p1596_p11 }
  0x3a   :  { %p1599_p0 = pnand %p1598_p13, %p1592_p10 }
  0x3c   :  { %1602 = shalt.err (!%p1599_p0)
}
  0x3d   :  { %68 = dma.hbm_to_vmem [thread:$0]  %s2272_s5, 1024, %s1734_s30, [#allocation8], %s1658_s0, %s1658_s0, %s1659_s22  }
  0x3e   :  { %s1663_s29 = smov [#allocation10]   ;;  %s1603_s13 = scalar_lea.hbm %s2274_s7, 2048 }
  0x3f   :  { %s76_s10 = sshll.u32 %s1663_s29, 4  ;;  %p1604_p1 = scmp.ne.s32.totalorder %s2274_s7, %s1603_s13  ;;  %s77_s10 = int_to_ptr.vmem [resolvable:$true] %s76_s10 }
  0x40   :  { %p1607_p2 = scmp.lt.u32.totalorder %s1603_s13, %s2274_s7 }
  0x42   :  { %p1609_p3 = pnand %p1607_p2, %p1604_p1 }
  0x44   :  { %1612 = shalt.err (!%p1609_p3)
}
  0x45   :  { %s1613_s17 = scalar_lea.vmem %s77_s10, 2048  ;;  %p1618_p5 = scmp.lt.s32.totalorder %s77_s10, %s77_s10 }
  0x46   :  { %p1614_p4 = scmp.ne.s32.totalorder %s77_s10, %s1613_s17  ;;  %p1619_p6 = scmp.lt.s32.totalorder %s1613_s17, %s1613_s17 }
  0x48   :  { %p1620_p7 = por %p1619_p6, %p1618_p5 }
  0x4a   :  { %p1621_p8 = pnand %p1620_p7, %p1614_p4 }
  0x4c   :  { %1624 = shalt.err (!%p1621_p8)
}
  0x4d   :  { %82 = dma.hbm_to_vmem [thread:$0]  %s2274_s7, 2048, %s77_s10, [#allocation11], %s1658_s0, %s1658_s0, %s1659_s22  }
  0x4e   :  { %1647 = dma.done.wait [#allocation5], 16  }
  0x4f   :  { %1648 = vsyncadd [#allocation5], 4294967280 }
  0x50   :  { %1649 = dma.done.wait [#allocation3], 1024  }
  0x51   :  { %1650 = vsyncadd [#allocation3], 4294966272 }
  0x52   :  { %1651 = dma.done.wait [#allocation8], 2048  }
  0x53   :  { %1652 = vsyncadd [#allocation8], 4294965248 }
  0x54   :  { %1653 = dma.done.wait [#allocation11], 2048  }
  0x55   :  { %1654 = vsyncadd [#allocation11], 4294965248 }
  0x56   :  { %100 = sfence }
  0x57   :  { %v1445_v0 = vld [vmem:[#allocation7] sm:$0xff]   ;;  %v1446_v1 = vld [vmem:[#allocation7 + $0x8] sm:$0xff]   ;;  %v1664_v2 = vmov 0   ;;  %v1447_v3 = vld [vmem:[#allocation7 + $0x10] sm:$0xff]   ;;  %s174_s7 = sld [smem:[#allocation2]]  ;;  %s1157_s18 = sld [smem:[#allocation2 + $0x1]] }
  0x58   :  { %1423 = vset.pattern.permute.xlu0 %v1664_v2  ;;  %1434 = vset.pattern.permute.xlu1 %v1664_v2  ;;  %v1448_v4 = vld [vmem:[#allocation7 + $0x18] sm:$0xff]   ;;  %v1786_v5 = vld [vmem:[#allocation6] sm:$0xff]   ;;  %v1794_v12 = vld [vmem:[#allocation6 + $0x8] sm:$0xff]   ;;  %s1818_s19 = sld [smem:[#allocation2 + $0x2]]  ;;  %s1158_s20 = sld [smem:[#allocation2 + $0x3]] }
  0x59   :  { %1366 = vmatprep.subr.bf16.mxu1 %v1445_v0  ;;  %v1788_v6 = vld [vmem:[#allocation6 + $0x20] sm:$0xff]   ;;  %v1240_v7 = vunpack.c.l.bf16 %v1786_v5  ;;  %v1241_v8 = vunpack.c.h.bf16 %v1786_v5  ;;  %v1798_v15 = vld [vmem:[#allocation6 + $0x28] sm:$0xff]   ;;  %v1244_v21 = vunpack.c.l.bf16 %v1794_v12  ;;  %v1245_v22 = vunpack.c.h.bf16 %v1794_v12  ;;  %v1812_v23 = vld [vmem:[#allocation6 + $0x10] sm:$0xff]   ;;  %s1179_s12 = sld [smem:[#allocation2 + $0x6]]  ;;  %s1180_s3 = sld [smem:[#allocation2 + $0x7]] }
  0x5a   :  { %1367 = vmatpush3.bf16.msra.mxu1 %v1445_v0  ;;  %v1256_v9 = vunpack.c.l.bf16 %v1788_v6  ;;  %v1257_v10 = vunpack.c.h.bf16 %v1788_v6  ;;  %v1449_v11 = vld [vmem:[#allocation7 + $0x20] sm:$0xff]   ;;  %v1450_v16 = vld [vmem:[#allocation7 + $0x28] sm:$0xff]   ;;  %v1260_v26 = vunpack.c.l.bf16 %v1798_v15  ;;  %v1261_v27 = vunpack.c.h.bf16 %v1798_v15  ;;  %v1822_v28 = vld [vmem:[#allocation6 + $0x30] sm:$0xff]   ;;  %s1178_s13 = sld [smem:[#allocation2 + $0x5]]  ;;  %s1182_s16 = sld [smem:[#allocation2 + $0x9]] }
  0x5b   :  { %1368 = vmatprep.subr.bf16.mxu1 %v1446_v1  ;;  %v1248_v30 = vunpack.c.l.bf16 %v1812_v23  ;;  %v1249_v31 = vunpack.c.h.bf16 %v1812_v23  ;;  %v1451_v32 = vld [vmem:[#allocation7 + $0x30] sm:$0xff]   ;;  %v1832_v35 = vld [vmem:[#allocation6 + $0x18] sm:$0xff]   ;;  %v1264_v38 = vunpack.c.l.bf16 %v1822_v28  ;;  %v1265_v39 = vunpack.c.h.bf16 %v1822_v28  ;;  %v1223_v50 = vld [vmem:[%s2269_s2] sm:$0xff]   ;;  %s1183_s11 = sld [smem:[#allocation2 + $0xa]]  ;;  %s2074_s17 = sld [smem:[#allocation2 + $0xc]] }
  0x5c   :  { %v1842_v40 = vld [vmem:[#allocation6 + $0x38] sm:$0xff]   ;;  %v1252_v48 = vunpack.c.l.bf16 %v1832_v35  ;;  %v1253_v49 = vunpack.c.h.bf16 %v1832_v35  ;;  %v1453_v52 = vld [vmem:[#allocation9] sm:$0xff]   ;;  %v1290_v57 = vld [vmem:[%s2269_s2 + $0x8] sm:$0xff]   ;;  %s2087_s5 = sld [smem:[#allocation2 + $0xd]] }
  0x5d   :  { %v175_v13 = vstv %s174_s7  ;;  %v1796_v14 = vstv %s1157_s18  ;;  %v1452_v41 = vld [vmem:[#allocation7 + $0x38] sm:$0xff]   ;;  %v1268_v53 = vunpack.c.l.bf16 %v1842_v40  ;;  %v1269_v54 = vunpack.c.h.bf16 %v1842_v40  ;;  %v1291_v58 = vld [vmem:[%s2269_s2 + $0x10] sm:$0xff]   ;;  %v1463_v40 = vld [vmem:[#allocation10 + $0x48] sm:$0xff]   ;;  %s1205_s18 = sld [smem:[#allocation2 + $0xf]] }
  0x5e   :  { %1369 = vmatpush3.bf16.msra.mxu1 %v1446_v1  ;;  %v176_v17 = vmul.f32 %v1240_v7, %v175_v13  ;;  %v177_v18 = vmul.f32 %v1241_v8, %v175_v13  ;;  %v229_v19 = vmul.f32 %v1256_v9, %v1796_v14  ;;  %v230_v20 = vmul.f32 %v1257_v10, %v1796_v14  ;;  %v1292_v60 = vld [vmem:[%s2269_s2 + $0x18] sm:$0xff]   ;;  %s1168_s2 = sld [smem:[#allocation2 + $0x4]] }
  0x5f   :  { %1370 = vmatprep.subr.bf16.mxu1 %v1447_v3  ;;  %v178_v33 = vmul.f32 %v1244_v21, %v175_v13  ;;  %v179_v34 = vmul.f32 %v1245_v22, %v175_v13  ;;  %v231_v36 = vmul.f32 %v1260_v26, %v1796_v14  ;;  %v232_v37 = vmul.f32 %v1261_v27, %v1796_v14  ;;  %v1460_v15 = vld [vmem:[#allocation9 + $0x38] sm:$0xff]  }
  0x60   :  { %v1814_v24 = vadd.f32 %v229_v19, %v176_v17  ;;  %v1816_v25 = vadd.f32 %v230_v20, %v177_v18  ;;  %v180_v42 = vmul.f32 %v1248_v30, %v175_v13  ;;  %v181_v43 = vmul.f32 %v1249_v31, %v175_v13 }
  0x61   :  { %v233_v44 = vmul.f32 %v1264_v38, %v1796_v14  ;;  %v234_v45 = vmul.f32 %v1265_v39, %v1796_v14  ;;  %v1854_v46 = vadd.f32 %v231_v36, %v178_v33  ;;  %v1856_v47 = vadd.f32 %v232_v37, %v179_v34  ;;  %v1455_v34 = vld [vmem:[#allocation9 + $0x10] sm:$0xff]  }
  0x62   :  { %1371 = vmatpush3.bf16.msra.mxu1 %v1447_v3  ;;  %v279_v29 = vpack.c.bf16 %v1816_v25, %v1814_v24  ;;  %v1864_v51 = vstv %s1818_s19  ;;  %v1878_v59 = vstv %s1158_s20  ;;  %v182_v62 = vmul.f32 %v1252_v48, %v175_v13  ;;  %s1665_s19 = smov [#allocation12]  }
  0x63   :  { %1372 = vmatprep.subr.bf16.mxu1 %v1448_v4  ;;  %v1868_v55 = vadd.f32 %v233_v44, %v180_v42  ;;  %v1870_v56 = vadd.f32 %v234_v45, %v181_v43  ;;  %v280_v61 = vpack.c.bf16 %v1856_v47, %v1854_v46  ;;  %v183_v63 = vmul.f32 %v1253_v49, %v175_v13  ;;  %v1456_v43 = vld [vmem:[#allocation9 + $0x18] sm:$0xff]   ;;  %v1457_v44 = vld [vmem:[#allocation9 + $0x20] sm:$0xff]   ;;  %v1458_v45 = vld [vmem:[#allocation9 + $0x28] sm:$0xff]   ;;  %s1141_s20 = sshll.u32 %s1665_s19, 4  ;;  %s1142_s20 = int_to_ptr.vmem [resolvable:$true] %s1141_s20 }
  0x64   :  { %1382 = vmatprep.mubr.bf16.mxu1 %v279_v29  ;;  %v194_v0 = vmul.f32 %v1240_v7, %v1864_v51  ;;  %v235_v1 = vmul.f32 %v1268_v53, %v1796_v14  ;;  %v236_v2 = vmul.f32 %v1269_v54, %v1796_v14  ;;  %v195_v3 = vmul.f32 %v1241_v8, %v1864_v51  ;;  %v1454_v14 = vld [vmem:[#allocation9 + $0x8] sm:$0xff]   ;;  %s1625_s21 = scalar_lea.vmem %s1142_s20, 512  ;;  %p1630_p10 = scmp.lt.s32.totalorder %s1142_s20, %s1142_s20 }
  0x65   :  { %v247_v7 = vmul.f32 %v1256_v9, %v1878_v59  ;;  %v248_v13 = vmul.f32 %v1257_v10, %v1878_v59  ;;  %v1228_v17 = vunpack.c.l.bf16 %v1290_v57  ;;  %v1229_v18 = vunpack.c.h.bf16 %v1290_v57  ;;  %p1626_p9 = scmp.ne.s32.totalorder %s1142_s20, %s1625_s21  ;;  %p1631_p11 = scmp.lt.s32.totalorder %s1625_s21, %s1625_s21 }
  0x66   :  { %1373 = vmatpush3.bf16.msra.mxu1 %v1448_v4  ;;  %v1224_v4 = vunpack.c.l.bf16 %v1223_v50  ;;  %v1232_v5 = vunpack.c.l.bf16 %v1291_v58  ;;  %v1233_v8 = vunpack.c.h.bf16 %v1291_v58  ;;  %v1236_v20 = vunpack.c.l.bf16 %v1292_v60 }
  0x67   :  { %1374 = vmatprep.subr.bf16.mxu1 %v1449_v11  ;;  %v1237_v29 = vunpack.c.h.bf16 %v1292_v60  ;;  %v1911_v33 = vadd.f32 %v236_v2, %v183_v63  ;;  %v1913_v6 = vadd.f32 %v247_v7, %v194_v0  ;;  %v1915_v10 = vadd.f32 %v248_v13, %v195_v3  ;;  %v1468_v2 = vld [vmem:[#allocation10 + $0x18] sm:$0xff]   ;;  %v1469_v3 = vld [vmem:[#allocation10 + $0x60] sm:$0xff]   ;;  %v1472_v7 = vld [vmem:[#allocation10 + $0x28] sm:$0xff]   ;;  %p1632_p12 = por %p1631_p11, %p1630_p10 }
  0x68   :  { %v1435_v9 = vpack.i.bf16 %v1233_v8, %v1232_v5  ;;  %v1429_v36 = vpack.i.bf16 %v1229_v18, %v1228_v17  ;;  %v197_v57 = vmul.f32 %v1245_v22, %v1864_v51  ;;  %v249_v58 = vmul.f32 %v1260_v26, %v1878_v59  ;;  %v1473_v13 = vld [vmem:[#allocation10 + $0x70] sm:$0xff]   ;;  %v1476_v17 = vld [vmem:[#allocation10 + $0x38] sm:$0xff]   ;;  %v1159_v8 = vld [vmem:[%s2271_s4] ss:$0 sm:$0xff]  ;;  %s2002_s4 = sld [smem:[#allocation2 + $0x8]] }
  0x69   :  { %v1440_v37 = vpack.i.bf16 %v1237_v29, %v1236_v20  ;;  %v445_v42 = vpack.c.bf16 %v1915_v10, %v1913_v6  ;;  %v250_v60 = vmul.f32 %v1261_v27, %v1878_v59  ;;  %v251_v12 = vmul.f32 %v1264_v38, %v1878_v59  ;;  %p1633_p13 = pnand %p1632_p12, %p1626_p9 }
  0x6a   :  { %1375 = vmatpush3.bf16.msra.mxu1 %v1449_v11  ;;  %v281_v11 = vpack.c.bf16 %v1870_v56, %v1868_v55  ;;  %1436 = vperm.xlu1 %1434, %v1435_v9   ;;  %v252_v22 = vmul.f32 %v1265_v39, %v1878_v59  ;;  %v200_v28 = vmul.f32 %v1252_v48, %v1864_v51  ;;  %v404_v5 = vstv %s1168_s2 }
  0x6b   :  { %1376 = vmatprep.subr.bf16.mxu1 %v1450_v16  ;;  %v1947_v27 = vadd.f32 %v250_v60, %v197_v57  ;;  %v253_v38 = vmul.f32 %v1268_v53, %v1878_v59  ;;  %v254_v39 = vmul.f32 %v1269_v54, %v1878_v59  ;;  %v1464_v53 = vld [vmem:[#allocation10 + $0x8] sm:$0xff]   ;;  %v1465_v54 = vld [vmem:[#allocation10 + $0x50] sm:$0xff]   ;;  %v407_v20 = vmul.f32 %v404_v5, %v1854_v46 }
  0x6c   :  { %v1466_v59 = vld [vmem:[#allocation10 + $0x10] sm:$0xff]   ;;  %v405_v29 = vmul.f32 %v404_v5, %v1814_v24 }
  0x6d   :  { %v1969_v0 = vadd.f32 %v253_v38, %v200_v28 }
  0x6e   :  { %1377 = vmatpush3.bf16.msra.mxu1 %v1450_v16  ;;  %v1225_v16 = vunpack.c.h.bf16 %v1223_v50  ;;  %1441 = vperm.xlu1 %1434, %v1440_v37   ;;  %v1459_v50 = vld [vmem:[#allocation9 + $0x30] sm:$0xff]   ;;  %v408_v37 = vmul.f32 %v404_v5, %v1856_v47 }
  0x6f   :  { %1378 = vmatprep.subr.bf16.mxu1 %v1451_v32 }
  0x70   :  { %v1424_v19 = vpack.i.bf16 %v1225_v16, %v1224_v4  ;;  %v1470_v4 = vld [vmem:[#allocation10 + $0x20] sm:$0xff]   ;;  %v1474_v16 = vld [vmem:[#allocation10 + $0x30] sm:$0xff]  }
  0x72   :  { %1379 = vmatpush3.bf16.msra.mxu1 %v1451_v32  ;;  %v1909_v32 = vadd.f32 %v235_v1, %v182_v62  ;;  %1425 = vperm.xlu0 %1423, %v1424_v19   ;;  %v1467_v1 = vld [vmem:[#allocation10 + $0x58] sm:$0xff]  }
  0x73   :  { %1380 = vmatprep.subr.bf16.mxu1 %v1452_v41 }
  0x74   :  { %v411_v38 = vmul.f32 %v404_v5, %v1909_v32 }
  0x76   :  { %1381 = vmatpush3.bf16.msra.mxu1 %v1452_v41  ;;  %v282_v41 = vpack.c.bf16 %v1911_v33, %v1909_v32  ;;  %1430 = vperm.xlu0 %1423, %v1429_v36  }
  0x77   :  { %1390 = vmatprep.subr.bf16.mxu1 %v1453_v52 }
  0x79   :  { %1383 = vmatmul.mubr.bf16.vlgmr.msra.gmra.mrb[0].mxu1 %v280_v61  ;;  %v198_v61 = vmul.f32 %v1248_v30, %v1864_v51 }
  0x7a   :  { %1391 = vmatpush3.bf16.msra.mxu1 %v1453_v52  ;;  %1386 = vmatprep.mubr.bf16.mxu1 %v281_v11  ;;  %v196_v52 = vmul.f32 %v1244_v21, %v1864_v51  ;;  %v199_v21 = vmul.f32 %v1249_v31, %v1864_v51  ;;  %v201_v31 = vmul.f32 %v1253_v49, %v1864_v51  ;;  %v1461_v49 = vld [vmem:[#allocation10 + $0x40] sm:$0xff]   ;;  %v1471_v11 = vld [vmem:[#allocation10 + $0x68] sm:$0xff]  }
  0x7b   :  { %1392 = vmatprep.subr.bf16.mxu1 %v1454_v14  ;;  %v1949_v30 = vadd.f32 %v251_v12, %v198_v61  ;;  %v1462_v51 = vld [vmem:[#allocation10] sm:$0xff]   ;;  %1326 = vmatprep.subr.bf16.mxu0 %v1461_v49 }
  0x7c   :  { %v1945_v26 = vadd.f32 %v249_v58, %v196_v52  ;;  %v1951_v62 = vadd.f32 %v252_v22, %v199_v21  ;;  %v1971_v48 = vadd.f32 %v254_v39, %v201_v31  ;;  %1327 = vmatpush3.bf16.msra.mxu0 %v1462_v51  ;;  %v2004_v31 = vstv %s1180_s3 }
  0x7d   :  { %1328 = vmatprep.subr.bf16.mxu0 %v1463_v40  ;;  %v412_v40 = vmul.f32 %v404_v5, %v1911_v33 }
  0x7e   :  { %1393 = vmatpush3.bf16.msra.mxu1 %v1454_v14  ;;  %v446_v23 = vpack.c.bf16 %v1947_v27, %v1945_v26  ;;  %v447_v63 = vpack.c.bf16 %v1951_v62, %v1949_v30  ;;  %v448_v35 = vpack.c.bf16 %v1971_v48, %v1969_v0  ;;  %v1475_v14 = vld [vmem:[#allocation10 + $0x78] sm:$0xff]  }
  0x7f   :  { %1394 = vmatprep.subr.bf16.mxu1 %v1455_v34 }
  0x80   :  { %1329 = vmatpush3.bf16.msra.mxu0 %v1464_v53  ;;  %v410_v53 = vmul.f32 %v404_v5, %v1870_v56 }
  0x81   :  { %1387 = vmatmul.mubr.bf16.gmra.mrb[4].mxu1 %v282_v41  ;;  %1330 = vmatprep.subr.bf16.mxu0 %v1465_v54 }
  0x82   :  { %1395 = vmatpush3.bf16.msra.mxu1 %v1455_v34  ;;  %1406 = vmatprep.mubr.bf16.mxu1 %v445_v42  ;;  %v406_v42 = vmul.f32 %v404_v5, %v1816_v25 }
  0x83   :  { %1396 = vmatprep.subr.bf16.mxu1 %v1456_v43 }
  0x84   :  { %1331 = vmatpush3.bf16.msra.mxu0 %v1466_v59 }
  0x85   :  { %1332 = vmatprep.subr.bf16.mxu0 %v1467_v1 }
  0x86   :  { %1397 = vmatpush3.bf16.msra.mxu1 %v1456_v43 }
  0x87   :  { %1398 = vmatprep.subr.bf16.mxu1 %v1457_v44 }
  0x88   :  { %1333 = vmatpush3.bf16.msra.mxu0 %v1468_v2 }
  0x89   :  { %1334 = vmatprep.subr.bf16.mxu0 %v1469_v3 }
  0x8a   :  { %1399 = vmatpush3.bf16.msra.mxu1 %v1457_v44 }
  0x8b   :  { %1400 = vmatprep.subr.bf16.mxu1 %v1458_v45 }
  0x8c   :  { %1335 = vmatpush3.bf16.msra.mxu0 %v1470_v4 }
  0x8d   :  { %1336 = vmatprep.subr.bf16.mxu0 %v1471_v11 }
  0x8e   :  { %1401 = vmatpush3.bf16.msra.mxu1 %v1458_v45 }
  0x8f   :  { %1402 = vmatprep.subr.bf16.mxu1 %v1459_v50 }
  0x90   :  { %1337 = vmatpush3.bf16.msra.mxu0 %v1472_v7 }
  0x91   :  { %1338 = vmatprep.subr.bf16.mxu0 %v1473_v13 }
  0x92   :  { %1403 = vmatpush3.bf16.msra.mxu1 %v1459_v50 }
  0x93   :  { %1404 = vmatprep.subr.bf16.mxu1 %v1460_v15 }
  0x94   :  { %1339 = vmatpush3.bf16.msra.mxu0 %v1474_v16 }
  0x95   :  { %1340 = vmatprep.subr.bf16.mxu0 %v1475_v14 }
  0x96   :  { %1405 = vmatpush3.bf16.msra.mxu1 %v1460_v15  ;;  %v1998_v15 = vstv %s1179_s12 }
  0x98   :  { %1341 = vmatpush3.bf16.msra.mxu0 %v1476_v17 }
  0x99   :  { %1407 = vmatmul.mubr.bf16.vlgmr.msra.gmra.mrb[8].mxu1 %v446_v23 }
  0x9a   :  { %1410 = vmatprep.mubr.bf16.mxu1 %v447_v63  ;;  %v409_v63 = vmul.f32 %v404_v5, %v1868_v55 }
  0xa1   :  { %1411 = vmatmul.mubr.bf16.gmra.mrb[12].mxu1 %v448_v35 }
  0xe9   :  { %v1989_v57 = vpop.permute.xlu1 %1436 }
  0xea   :  { %v1439_v49 = vunpack.i.h.bf16 %v1989_v57  ;;  %v1438_v2 = vunpack.i.l.bf16 %v1989_v57 }
  0xed   :  { %v2008_v35 = vpop.permute.xlu1 %1441 }
  0xee   :  { %v1444_v55 = vunpack.i.h.bf16 %v2008_v35  ;;  %v1443_v11 = vunpack.i.l.bf16 %v2008_v35 }
  0xf1   :  { %v1975_v18 = vpop.permute.xlu0 %1425 }
  0xf2   :  { %v1427_v43 = vunpack.i.l.bf16 %v1975_v18  ;;  %v1428_v58 = vunpack.i.h.bf16 %v1975_v18 }
  0xf5   :  { %v1980_v19 = vpop.permute.xlu0 %1430 }
  0xf6   :  { %v1432_v41 = vunpack.i.l.bf16 %v1980_v19  ;;  %v1433_v46 = vunpack.i.h.bf16 %v1980_v19 }
 0x14c   :  { %v1384_v9 = vpop.f32.mrb[0].mxu1 }
 0x14d   :  { %v381_v34 = vadd.f32 %v1384_v9, %v1159_v8  ;;  %v372_v36 = vpop.f32.mrb[1].mxu1 }
 0x14e   :  { %v373_v44 = vadd.f32 %v1159_v8, %v372_v36  ;;  %v1385_v45 = vpop.f32.mrb[2].mxu1  ;;  %v640_v36 = vstv %s2002_s4 }
 0x14f   :  { %v415_v50 = vadd.f32 %v407_v20, %v381_v34  ;;  %v384_v52 = vadd.f32 %v1385_v45, %v1159_v8  ;;  %v375_v24 = vpop.f32.mrb[3].mxu1 }
 0x150   :  { %v413_v60 = vadd.f32 %v405_v29, %v373_v44  ;;  %v376_v61 = vadd.f32 %v1159_v8, %v375_v24 }
 0x151   :  { %v416_v47 = vadd.f32 %v408_v37, %v384_v52  ;;  %v423_v21 = vmul.f32 %v1432_v41, %v415_v50 }
 0x152   :  { %v421_v25 = vmul.f32 %v1427_v43, %v413_v60  ;;  %v414_v12 = vadd.f32 %v406_v42, %v376_v61 }
 0x153   :  { %v424_v22 = vmul.f32 %v1433_v46, %v416_v47  ;;  %1477 = vtanh.f32 %v423_v21  ;;  %v608_v54 = vmax.f32 %v423_v21, 0.0  ;;  %v599_v5 = vmul.f32 %v1998_v15, %v423_v21 }
 0x154   :  { %1479 = vtanh.f32 %v421_v25  ;;  %v422_v23 = vmul.f32 %v1428_v58, %v414_v12  ;;  %v1388_v28 = vpop.f32.mrb[4].mxu1  ;;  %v606_v7 = vmax.f32 %v421_v25, 0.0  ;;  %v597_v42 = vmul.f32 %v1998_v15, %v421_v25 }
 0x155   :  { %1481 = vtanh.f32 %v424_v22  ;;  %v388_v39 = vpop.f32.mrb[5].mxu1  ;;  %v397_v59 = vadd.f32 %v1388_v28, %v1159_v8  ;;  %v609_v33 = vmax.f32 %v424_v22, 0.0  ;;  %v617_v20 = vmul.f32 %v2004_v31, %v608_v54 }
 0x156   :  { %1483 = vtanh.f32 %v422_v23  ;;  %v1389_v51 = vpop.f32.mrb[6].mxu1  ;;  %v389_v1 = vadd.f32 %v1159_v8, %v388_v39  ;;  %v607_v13 = vmax.f32 %v422_v23, 0.0  ;;  %v615_v44 = vmul.f32 %v2004_v31, %v606_v7 }
 0x157   :  { %v391_v3 = vpop.f32.mrb[7].mxu1  ;;  %v400_v32 = vadd.f32 %v1389_v51, %v1159_v8  ;;  %v419_v16 = vadd.f32 %v411_v38, %v397_v59  ;;  %v600_v52 = vmul.f32 %v1998_v15, %v424_v22  ;;  %v618_v24 = vmul.f32 %v2004_v31, %v609_v33 }
 0x158   :  { %v392_v4 = vadd.f32 %v1159_v8, %v391_v3  ;;  %v417_v14 = vadd.f32 %v409_v63, %v389_v1  ;;  %v616_v45 = vmul.f32 %v2004_v31, %v607_v13  ;;  %v625_v47 = vadd.f32 %v617_v20, %v599_v5 }
 0x159   :  { %v420_v17 = vadd.f32 %v412_v40, %v400_v32  ;;  %v427_v34 = vmul.f32 %v1443_v11, %v419_v16  ;;  %v598_v21 = vmul.f32 %v1998_v15, %v422_v23  ;;  %v623_v51 = vadd.f32 %v615_v44, %v597_v42 }
 0x15a   :  { %v418_v56 = vadd.f32 %v410_v53, %v392_v4  ;;  %v425_v29 = vmul.f32 %v1438_v2, %v417_v14  ;;  %v626_v53 = vadd.f32 %v618_v24, %v600_v52  ;;  %v570_v42 = vstv %s1178_s13 }
 0x15b   :  { %v428_v9 = vmul.f32 %v1444_v55, %v420_v17  ;;  %v612_v63 = vmax.f32 %v427_v34, 0.0  ;;  %v624_v40 = vadd.f32 %v616_v45, %v598_v21  ;;  %v603_v33 = vmul.f32 %v1998_v15, %v427_v34 }
 0x15c   :  { %v426_v8 = vmul.f32 %v1439_v49, %v418_v56  ;;  %1485 = vtanh.f32 %v425_v29  ;;  %v610_v60 = vmax.f32 %v425_v29, 0.0  ;;  %v601_v54 = vmul.f32 %v1998_v15, %v425_v29 }
 0x15d   :  { %v1478_v37 = vpop.eup %1477  ;;  %v613_v25 = vmax.f32 %v428_v9, 0.0  ;;  %v604_v7 = vmul.f32 %v1998_v15, %v428_v9  ;;  %v621_v17 = vmul.f32 %v2004_v31, %v612_v63  ;;  %v578_v19 = vmul.f32 %v570_v42, %v1971_v48 }
 0x15e   :  { %v1480_v50 = vpop.eup %1479  ;;  %1487 = vtanh.f32 %v426_v8  ;;  %v611_v12 = vmax.f32 %v426_v8, 0.0  ;;  %v643_v39 = vmul.f32 %v1478_v37, %v640_v36  ;;  %v619_v59 = vmul.f32 %v2004_v31, %v610_v60 }
 0x15f   :  { %v1482_v61 = vpop.eup %1481  ;;  %1489 = vtanh.f32 %v428_v9  ;;  %v641_v38 = vmul.f32 %v1480_v50, %v640_v36  ;;  %v602_v23 = vmul.f32 %v1998_v15, %v426_v8  ;;  %v622_v13 = vmul.f32 %v2004_v31, %v613_v25  ;;  %v1169_v15 = vld [vmem:[%s2273_s6] ss:$0 sm:$0xff]  ;;  %s2070_s6 = sld [smem:[#allocation2 + $0xb]] }
 0x160   :  { %v1484_v28 = vpop.eup %1483  ;;  %1491 = vtanh.f32 %v427_v34  ;;  %v644_v1 = vmul.f32 %v1482_v61, %v640_v36  ;;  %v620_v3 = vmul.f32 %v2004_v31, %v611_v12  ;;  %v2043_v16 = vadd.f32 %v643_v39, %v625_v47 }
 0x161   :  { %v642_v22 = vmul.f32 %v1484_v28, %v640_v36  ;;  %v2037_v32 = vadd.f32 %v641_v38, %v623_v51  ;;  %v627_v5 = vadd.f32 %v619_v59, %v601_v54  ;;  %v630_v37 = vadd.f32 %v622_v13, %v604_v7 }
 0x162   :  { %v2045_v14 = vadd.f32 %v644_v1, %v626_v53  ;;  %v628_v8 = vadd.f32 %v620_v3, %v602_v23  ;;  %v629_v50 = vadd.f32 %v621_v17, %v603_v33  ;;  %v573_v60 = vmul.f32 %v570_v42, %v1945_v26 }
 0x163   :  { %v2039_v4 = vadd.f32 %v642_v22, %v624_v40  ;;  %v571_v12 = vmul.f32 %v570_v42, %v1913_v6  ;;  %v574_v39 = vmul.f32 %v570_v42, %v1947_v27  ;;  %v572_v26 = vmul.f32 %v570_v42, %v1915_v10 }
 0x164   :  { %v753_v20 = vpack.c.bf16 %v2045_v14, %v2043_v16  ;;  %v2078_v3 = vstv %s1182_s16  ;;  %v2080_v7 = vstv %s1183_s11 }
 0x165   :  { %v751_v56 = vpack.c.bf16 %v2039_v4, %v2037_v32 }
 0x166   :  { %v1486_v29 = vpop.eup %1485 }
 0x167   :  { %v645_v44 = vmul.f32 %v1486_v29, %v640_v36 }
 0x168   :  { %v1488_v9 = vpop.eup %1487 }
 0x169   :  { %v1490_v45 = vpop.eup %1489  ;;  %v646_v52 = vmul.f32 %v1488_v9, %v640_v36  ;;  %v2056_v31 = vadd.f32 %v645_v44, %v627_v5  ;;  %v577_v5 = vmul.f32 %v570_v42, %v1969_v0 }
 0x16a   :  { %v1492_v24 = vpop.eup %1491  ;;  %v648_v34 = vmul.f32 %v1490_v45, %v640_v36 }
 0x16b   :  { %v2059_v61 = vadd.f32 %v646_v52, %v628_v8  ;;  %v647_v47 = vmul.f32 %v1492_v24, %v640_v36  ;;  %v2096_v24 = vstv %s2070_s6 }
 0x16c   :  { %v1408_v21 = vpop.f32.mrb[8].mxu1  ;;  %v2062_v28 = vadd.f32 %v648_v34, %v630_v37  ;;  %v2099_v34 = vstv %s2074_s17 }
 0x16d   :  { %v547_v25 = vadd.f32 %v1408_v21, %v1169_v15  ;;  %v538_v38 = vpop.f32.mrb[9].mxu1  ;;  %v755_v63 = vpack.c.bf16 %v2059_v61, %v2056_v31  ;;  %v2067_v51 = vadd.f32 %v647_v47, %v629_v50 }
 0x16e   :  { %v539_v40 = vadd.f32 %v1169_v15, %v538_v38  ;;  %v1409_v22 = vpop.f32.mrb[10].mxu1 }
 0x16f   :  { %v581_v53 = vadd.f32 %v573_v60, %v547_v25  ;;  %v550_v36 = vadd.f32 %v1409_v22, %v1169_v15  ;;  %v541_v54 = vpop.f32.mrb[11].mxu1  ;;  %v757_v6 = vpack.c.bf16 %v2062_v28, %v2067_v51 }
 0x170   :  { %v579_v27 = vadd.f32 %v571_v12, %v539_v40  ;;  %v542_v59 = vadd.f32 %v1169_v15, %v541_v54 }
 0x171   :  { %v589_v1 = vmul.f32 %v1432_v41, %v581_v53  ;;  %v582_v23 = vadd.f32 %v574_v39, %v550_v36  ;;  %v2115_v53 = vstv %s2087_s5 }
 0x172   :  { %v587_v10 = vmul.f32 %v1427_v43, %v579_v27  ;;  %v580_v13 = vadd.f32 %v572_v26, %v542_v59  ;;  %v575_v43 = vmul.f32 %v570_v42, %v1949_v30 }
 0x173   :  { %v670_v33 = vmax.f32 %v589_v1, 0.0  ;;  %1493 = vtanh.f32 %v589_v1  ;;  %v590_v17 = vmul.f32 %v1433_v46, %v582_v23  ;;  %v576_v46 = vmul.f32 %v570_v42, %v1951_v62 }
 0x174   :  { %v668_v29 = vmax.f32 %v587_v10, 0.0  ;;  %1495 = vtanh.f32 %v587_v10  ;;  %v588_v41 = vmul.f32 %v1428_v58, %v580_v13  ;;  %v1412_v8 = vpop.f32.mrb[12].mxu1  ;;  %v661_v62 = vmul.f32 %v2078_v3, %v589_v1 }
 0x175   :  { %v671_v9 = vmax.f32 %v590_v17, 0.0  ;;  %1497 = vtanh.f32 %v590_v17  ;;  %v554_v37 = vpop.f32.mrb[13].mxu1  ;;  %v563_v44 = vadd.f32 %v1412_v8, %v1169_v15  ;;  %v679_v18 = vmul.f32 %v2080_v7, %v670_v33 }
 0x176   :  { %v669_v0 = vmax.f32 %v588_v41, 0.0  ;;  %1499 = vtanh.f32 %v588_v41  ;;  %v555_v45 = vadd.f32 %v1169_v15, %v554_v37  ;;  %v1413_v50 = vpop.f32.mrb[14].mxu1  ;;  %v677_v48 = vmul.f32 %v2080_v7, %v668_v29 }
 0x177   :  { %v566_v58 = vadd.f32 %v1413_v50, %v1169_v15  ;;  %v557_v52 = vpop.f32.mrb[15].mxu1  ;;  %v585_v30 = vadd.f32 %v577_v5, %v563_v44  ;;  %v680_v42 = vmul.f32 %v2080_v7, %v671_v9  ;;  %v659_v40 = vmul.f32 %v2078_v3, %v587_v10 }
 0x178   :  { %v583_v60 = vadd.f32 %v575_v43, %v555_v45  ;;  %v558_v47 = vadd.f32 %v1169_v15, %v557_v52  ;;  %v678_v12 = vmul.f32 %v2080_v7, %v669_v0  ;;  %v662_v15 = vmul.f32 %v2078_v3, %v590_v17 }
 0x179   :  { %v586_v21 = vadd.f32 %v578_v19, %v566_v58  ;;  %v593_v25 = vmul.f32 %v1443_v11, %v585_v30  ;;  %v660_v26 = vmul.f32 %v2078_v3, %v588_v41  ;;  %v685_v54 = vadd.f32 %v677_v48, %v659_v40 }
 0x17a   :  { %v591_v38 = vmul.f32 %v1438_v2, %v583_v60  ;;  %v584_v39 = vadd.f32 %v576_v46, %v558_v47  ;;  %v687_v27 = vadd.f32 %v679_v18, %v661_v62  ;;  %v688_v1 = vadd.f32 %v680_v42, %v662_v15 }
 0x17b   :  { %v594_v22 = vmul.f32 %v1444_v55, %v586_v21  ;;  %v674_v36 = vmax.f32 %v593_v25, 0.0  ;;  %1501 = vtanh.f32 %v593_v25  ;;  %v686_v2 = vadd.f32 %v678_v12, %v660_v26 }
 0x17c   :  { %v672_v59 = vmax.f32 %v591_v38, 0.0  ;;  %1503 = vtanh.f32 %v591_v38  ;;  %v592_v35 = vmul.f32 %v1439_v49, %v584_v39  ;;  %v665_v33 = vmul.f32 %v2078_v3, %v593_v25 }
 0x17d   :  { %v1494_v11 = vpop.eup %1493  ;;  %v675_v10 = vmax.f32 %v594_v22, 0.0  ;;  %1505 = vtanh.f32 %v594_v22  ;;  %v663_v17 = vmul.f32 %v2078_v3, %v591_v38  ;;  %v666_v5 = vmul.f32 %v2078_v3, %v594_v22 }
 0x17e   :  { %v1496_v23 = vpop.eup %1495  ;;  %v705_v55 = vmul.f32 %v1494_v11, %v2096_v24  ;;  %v683_v8 = vmul.f32 %v2080_v7, %v674_v36  ;;  %v673_v43 = vmax.f32 %v592_v35, 0.0  ;;  %1507 = vtanh.f32 %v592_v35 }
 0x17f   :  { %v1498_v13 = vpop.eup %1497  ;;  %v703_v29 = vmul.f32 %v1496_v23, %v2096_v24  ;;  %v681_v57 = vmul.f32 %v2080_v7, %v672_v59  ;;  %v684_v46 = vmul.f32 %v2080_v7, %v675_v10  ;;  %v664_v0 = vmul.f32 %v2078_v3, %v592_v35 }
 0x180   :  { %v1500_v41 = vpop.eup %1499  ;;  %v706_v9 = vmul.f32 %v1498_v13, %v2096_v24  ;;  %v713_v19 = vadd.f32 %v705_v55, %v687_v27  ;;  %v682_v44 = vmul.f32 %v2080_v7, %v673_v43  ;;  %v691_v60 = vadd.f32 %v683_v8, %v665_v33 }
 0x181   :  { %v704_v49 = vmul.f32 %v1500_v41, %v2096_v24  ;;  %v711_v37 = vadd.f32 %v703_v29, %v685_v54  ;;  %v689_v27 = vadd.f32 %v681_v57, %v663_v17 }
 0x182   :  { %v714_v45 = vadd.f32 %v706_v9, %v688_v1  ;;  %v930_v52 = vadd.f32 %v713_v19, %v2043_v16  ;;  %v948_v47 = vmul.f32 %v713_v19, %v2043_v16  ;;  %v692_v1 = vadd.f32 %v684_v46, %v666_v5 }
 0x183   :  { %v712_v50 = vadd.f32 %v704_v49, %v686_v2  ;;  %v928_v18 = vadd.f32 %v711_v37, %v2037_v32  ;;  %v946_v58 = vmul.f32 %v711_v37, %v2037_v32  ;;  %v690_v13 = vadd.f32 %v682_v44, %v664_v0 }
 0x184   :  { %v754_v30 = vpack.c.bf16 %v714_v45, %v713_v19  ;;  %v931_v48 = vadd.f32 %v714_v45, %v2045_v14  ;;  %v939_v25 = vmul.f32 %v2099_v34, %v930_v52  ;;  %v957_v38 = vmul.f32 %v2115_v53, %v948_v47 }
 0x185   :  { %v752_v62 = vpack.c.bf16 %v712_v50, %v711_v37  ;;  %v937_v42 = vmul.f32 %v2099_v34, %v928_v18  ;;  %v955_v3 = vmul.f32 %v2115_v53, %v946_v58  ;;  %v929_v7 = vadd.f32 %v712_v50, %v2039_v4  ;;  %v1502_v21 = vpop.eup %1501 }
 0x186   :  { %v947_v12 = vmul.f32 %v712_v50, %v2039_v4  ;;  %v940_v39 = vmul.f32 %v2099_v34, %v931_v48  ;;  %v1504_v40 = vpop.eup %1503  ;;  %v709_v15 = vmul.f32 %v1502_v21, %v2096_v24  ;;  %v949_v36 = vmul.f32 %v714_v45, %v2045_v14  ;;  %v1185_v14 = vld [vmem:[%s2275_s8] ss:$0 sm:$0xff]  ;;  %s1204_s8 = sld [smem:[#allocation2 + $0xe]] }
 0x187   :  { %894 = vmatprep.mubr.bf16.mxu0 %v752_v62  ;;  %v963_v22 = vadd.f32 %v955_v3, %v937_v42  ;;  %v938_v26 = vmul.f32 %v2099_v34, %v929_v7  ;;  %v1506_v54 = vpop.eup %1505  ;;  %v707_v11 = vmul.f32 %v1504_v40, %v2096_v24  ;;  %v965_v2 = vadd.f32 %v957_v38, %v939_v25 }
 0x188   :  { %895 = vmatmul.mubr.bf16.vlgmr.msra.gmra.mrb[0].mxu0 %v751_v56  ;;  %v956_v59 = vmul.f32 %v2115_v53, %v947_v12  ;;  %v710_v23 = vmul.f32 %v1506_v54, %v2096_v24  ;;  %v717_v10 = vadd.f32 %v709_v15, %v691_v60  ;;  %v958_v35 = vmul.f32 %v2115_v53, %v949_v36  ;;  %v1508_v55 = vpop.eup %1507 }
 0x189   :  { %902 = vmatprep.mubr.bf16.mxu0 %v754_v30  ;;  %v715_v33 = vadd.f32 %v707_v11, %v689_v27  ;;  %v708_v32 = vmul.f32 %v1508_v55, %v2096_v24 }
 0x18a   :  { %v964_v29 = vadd.f32 %v956_v59, %v938_v26  ;;  %v718_v4 = vadd.f32 %v710_v23, %v692_v1  ;;  %v966_v56 = vadd.f32 %v958_v35, %v940_v39  ;;  %v934_v17 = vadd.f32 %v717_v10, %v2067_v51 }
 0x18b   :  { %v932_v41 = vadd.f32 %v715_v33, %v2056_v31  ;;  %v950_v8 = vmul.f32 %v715_v33, %v2056_v31  ;;  %v952_v5 = vmul.f32 %v717_v10, %v2067_v51  ;;  %v716_v43 = vadd.f32 %v708_v32, %v690_v13 }
 0x18c   :  { %v758_v9 = vpack.c.bf16 %v718_v4, %v717_v10  ;;  %v943_v57 = vmul.f32 %v2099_v34, %v934_v17  ;;  %v935_v49 = vadd.f32 %v718_v4, %v2062_v28  ;;  %v953_v46 = vmul.f32 %v718_v4, %v2062_v28 }
 0x18d   :  { %v941_v37 = vmul.f32 %v2099_v34, %v932_v41  ;;  %v959_v24 = vmul.f32 %v2115_v53, %v950_v8  ;;  %v961_v19 = vmul.f32 %v2115_v53, %v952_v5  ;;  %v756_v0 = vpack.c.bf16 %v716_v43, %v715_v33 }
 0x18e   :  { %v933_v44 = vadd.f32 %v716_v43, %v2059_v61  ;;  %v951_v45 = vmul.f32 %v716_v43, %v2059_v61  ;;  %v944_v50 = vmul.f32 %v2099_v34, %v935_v49  ;;  %v962_v52 = vmul.f32 %v2115_v53, %v953_v46 }
 0x18f   :  { %v967_v18 = vadd.f32 %v959_v24, %v941_v37  ;;  %v969_v58 = vadd.f32 %v961_v19, %v943_v57 }
 0x190   :  { %903 = vmatmul.mubr.bf16.gmra.mrb[4].mxu0 %v753_v20  ;;  %v942_v30 = vmul.f32 %v2099_v34, %v933_v44  ;;  %v960_v60 = vmul.f32 %v2115_v53, %v951_v45  ;;  %v970_v47 = vadd.f32 %v962_v52, %v944_v50 }
 0x191   :  { %910 = vmatprep.mubr.bf16.mxu0 %v756_v0 }
 0x192   :  { %v968_v48 = vadd.f32 %v960_v60, %v942_v30 }
 0x198   :  { %911 = vmatmul.mubr.bf16.gmra.mrb[8].mxu0 %v755_v63 }
 0x199   :  { %918 = vmatprep.mubr.bf16.mxu0 %v758_v9 }
 0x1a0   :  { %919 = vmatmul.mubr.bf16.gmra.mrb[12].mxu0 %v757_v6 }
 0x25b   :  { %v1342_v16 = vpop.f32.mrb[0].mxu0 }
 0x25c   :  { %v1343_v20 = vpop.f32.mrb[1].mxu0 }
 0x25d   :  { %v1344_v34 = vadd.f32 %v1343_v20, %v1342_v16  ;;  %v1345_v62 = vpop.f32.mrb[2].mxu0 }
 0x25e   :  { %v1346_v53 = vpop.f32.mrb[3].mxu0 }
 0x25f   :  { %v897_v42 = vadd.f32 %v1344_v34, %v1185_v14  ;;  %v1347_v3 = vadd.f32 %v1346_v53, %v1345_v62 }
 0x261   :  { %v900_v7 = vadd.f32 %v1347_v3, %v1185_v14  ;;  %v2182_v21 = vadd.f32 %v963_v22, %v897_v42 }
 0x263   :  { %v1348_v31 = vpop.f32.mrb[4].mxu0  ;;  %979 = vadd.xlane.f32.xlu0 %v2182_v21  ;;  %v2185_v61 = vadd.f32 %v964_v29, %v900_v7 }
 0x264   :  { %v1349_v28 = vpop.f32.mrb[5].mxu0 }
 0x265   :  { %v1350_v63 = vadd.f32 %v1349_v28, %v1348_v31  ;;  %v1351_v51 = vpop.f32.mrb[6].mxu0  ;;  %981 = vadd.xlane.f32.xlu1 %v2185_v61 }
 0x266   :  { %v1352_v6 = vpop.f32.mrb[7].mxu0 }
 0x267   :  { %v905_v12 = vadd.f32 %v1350_v63, %v1185_v14  ;;  %v1353_v25 = vadd.f32 %v1352_v6, %v1351_v51 }
 0x269   :  { %v908_v38 = vadd.f32 %v1353_v25, %v1185_v14  ;;  %v2188_v39 = vadd.f32 %v965_v2, %v905_v12 }
 0x26b   :  { %v1354_v40 = vpop.f32.mrb[8].mxu0  ;;  %983 = vadd.xlane.f32.xlu0 %v2188_v39  ;;  %v2191_v15 = vadd.f32 %v966_v56, %v908_v38 }
 0x26c   :  { %v1355_v22 = vpop.f32.mrb[9].mxu0 }
 0x26d   :  { %v1356_v26 = vadd.f32 %v1355_v22, %v1354_v40  ;;  %v1357_v36 = vpop.f32.mrb[10].mxu0 }
 0x26e   :  { %v1358_v54 = vpop.f32.mrb[11].mxu0 }
 0x26f   :  { %v913_v27 = vadd.f32 %v1356_v26, %v1185_v14  ;;  %v1359_v11 = vadd.f32 %v1358_v54, %v1357_v36  ;;  %985 = vadd.xlane.f32.xlu0 %v2191_v15 }
 0x271   :  { %v916_v59 = vadd.f32 %v1359_v11, %v1185_v14  ;;  %v2194_v1 = vadd.f32 %v967_v18, %v913_v27  ;;  %v1069_v27 = vstv %s1204_s8 }
 0x273   :  { %v1360_v23 = vpop.f32.mrb[12].mxu0  ;;  %987 = vadd.xlane.f32.xlu1 %v2194_v1  ;;  %v2197_v2 = vadd.f32 %v968_v48, %v916_v59 }
 0x274   :  { %v1361_v10 = vpop.f32.mrb[13].mxu0 }
 0x275   :  { %v1362_v35 = vadd.f32 %v1361_v10, %v1360_v23  ;;  %v1363_v55 = vpop.f32.mrb[14].mxu0  ;;  %989 = vadd.xlane.f32.xlu0 %v2197_v2  ;;  %v1079_v10 = vstv %s1205_s18 }
 0x276   :  { %v1364_v13 = vpop.f32.mrb[15].mxu0 }
 0x277   :  { %v921_v33 = vadd.f32 %v1362_v35, %v1185_v14  ;;  %v1365_v29 = vadd.f32 %v1364_v13, %v1363_v55 }
 0x279   :  { %v924_v32 = vadd.f32 %v1365_v29, %v1185_v14  ;;  %v2200_v4 = vadd.f32 %v969_v58, %v921_v33 }
 0x27b   :  { %991 = vadd.xlane.f32.xlu1 %v2200_v4  ;;  %v2203_v56 = vadd.f32 %v970_v47, %v924_v32 }
 0x27d   :  { %993 = vadd.xlane.f32.xlu0 %v2203_v56 }
 0x2f0   :  { %v980_v17 = vpop.xlane.xlu0 %979 }
 0x2f1   :  { %v996_v41 = vmul.f32 0.0078125, %v980_v17  ;;  %v1080_v17 = vmul.f32 %v1079_v10, %v2182_v21 }
 0x2f2   :  { %v982_v8 = vpop.xlane.xlu1 %981 }
 0x2f3   :  { %v1004_v5 = vsub.f32 %v2182_v21, %v996_v41  ;;  %v997_v43 = vmul.f32 0.0078125, %v982_v8  ;;  %v1081_v41 = vmul.f32 %v1079_v10, %v2185_v61 }
 0x2f5   :  { %v1005_v9 = vsub.f32 %v2185_v61, %v997_v43  ;;  %v1012_v57 = vmul.f32 %v1004_v5, %v1004_v5 }
 0x2f7   :  { %1020 = vadd.xlane.f32.xlu1 %v1012_v57  ;;  %v1013_v49 = vmul.f32 %v1005_v9, %v1005_v9 }
 0x2f8   :  { %v984_v37 = vpop.xlane.xlu0 %983 }
 0x2f9   :  { %v998_v24 = vmul.f32 0.0078125, %v984_v37  ;;  %1022 = vadd.xlane.f32.xlu0 %v1013_v49 }
 0x2fb   :  { %v2209_v19 = vsub.f32 %v2188_v39, %v998_v24 }
 0x2fc   :  { %v986_v46 = vpop.xlane.xlu0 %985 }
 0x2fd   :  { %v999_v0 = vmul.f32 0.0078125, %v986_v46  ;;  %v1014_v44 = vmul.f32 %v2209_v19, %v2209_v19 }
 0x2ff   :  { %v2214_v45 = vsub.f32 %v2191_v15, %v999_v0  ;;  %1024 = vadd.xlane.f32.xlu1 %v1014_v44 }
 0x300   :  { %v988_v50 = vpop.xlane.xlu1 %987 }
 0x301   :  { %v1000_v18 = vmul.f32 0.0078125, %v988_v50  ;;  %v1015_v58 = vmul.f32 %v2214_v45, %v2214_v45 }
 0x302   :  { %v990_v52 = vpop.xlane.xlu0 %989 }
 0x303   :  { %v2219_v30 = vsub.f32 %v2194_v1, %v1000_v18  ;;  %v1001_v60 = vmul.f32 0.0078125, %v990_v52  ;;  %1026 = vadd.xlane.f32.xlu0 %v1015_v58  ;;  %v1082_v52 = vmul.f32 %v1079_v10, %v2188_v39 }
 0x305   :  { %v2222_v47 = vsub.f32 %v2197_v2, %v1001_v60  ;;  %v1016_v48 = vmul.f32 %v2219_v30, %v2219_v30  ;;  %v1083_v60 = vmul.f32 %v1079_v10, %v2191_v15 }
 0x307   :  { %1028 = vadd.xlane.f32.xlu1 %v1016_v48  ;;  %v1017_v16 = vmul.f32 %v2222_v47, %v2222_v47 }
 0x308   :  { %v992_v14 = vpop.xlane.xlu1 %991 }
 0x309   :  { %v1002_v20 = vmul.f32 0.0078125, %v992_v14  ;;  %1030 = vadd.xlane.f32.xlu0 %v1017_v16 }
 0x30a   :  { %v994_v34 = vpop.xlane.xlu0 %993 }
 0x30b   :  { %v2229_v62 = vsub.f32 %v2200_v4, %v1002_v20  ;;  %v1003_v53 = vmul.f32 0.0078125, %v994_v34 }
 0x30d   :  { %v2232_v42 = vsub.f32 %v2203_v56, %v1003_v53  ;;  %v1018_v3 = vmul.f32 %v2229_v62, %v2229_v62 }
 0x30f   :  { %1032 = vadd.xlane.f32.xlu1 %v1018_v3  ;;  %v1019_v7 = vmul.f32 %v2232_v42, %v2232_v42 }
 0x311   :  { %1034 = vadd.xlane.f32.xlu0 %v1019_v7 }
 0x384   :  { %v1021_v31 = vpop.xlane.xlu1 %1020 }
 0x385   :  { %v1036_v28 = vmul.f32 0.0078125, %v1021_v31  ;;  %v1085_v31 = vmul.f32 %v1079_v10, %v2197_v2 }
 0x386   :  { %v1023_v63 = vpop.xlane.xlu0 %1022 }
 0x387   :  { %v1044_v51 = vadd.f32 1e-05, %v1036_v28  ;;  %v1037_v6 = vmul.f32 0.0078125, %v1023_v63 }
 0x389   :  { %1509 = vrsqrt.f32 %v1044_v51  ;;  %v1045_v12 = vadd.f32 1e-05, %v1037_v6 }
 0x38b   :  { %1511 = vrsqrt.f32 %v1045_v12 }
 0x38c   :  { %v1025_v25 = vpop.xlane.xlu1 %1024 }
 0x38d   :  { %v1038_v38 = vmul.f32 0.0078125, %v1025_v25 }
 0x38f   :  { %v1046_v40 = vadd.f32 1e-05, %v1038_v38  ;;  %v1087_v38 = vmul.f32 %v1079_v10, %v2203_v56 }
 0x390   :  { %v1027_v22 = vpop.xlane.xlu0 %1026 }
 0x391   :  { %1513 = vrsqrt.f32 %v1046_v40  ;;  %v1039_v26 = vmul.f32 0.0078125, %v1027_v22 }
 0x393   :  { %v1510_v36 = vpop.eup %1509  ;;  %v1047_v54 = vadd.f32 1e-05, %v1039_v26 }
 0x394   :  { %v1029_v11 = vpop.xlane.xlu1 %1028  ;;  %v1060_v59 = vmul.f32 %v1510_v36, %v1004_v5 }
 0x395   :  { %v1512_v23 = vpop.eup %1511  ;;  %1515 = vrsqrt.f32 %v1047_v54  ;;  %v1040_v35 = vmul.f32 0.0078125, %v1029_v11 }
 0x396   :  { %v1031_v55 = vpop.xlane.xlu0 %1030  ;;  %v1061_v13 = vmul.f32 %v1512_v23, %v1005_v9  ;;  %v1070_v33 = vmul.f32 %v1069_v27, %v1060_v59 }
 0x397   :  { %v1048_v29 = vadd.f32 1e-05, %v1040_v35  ;;  %v1041_v32 = vmul.f32 0.0078125, %v1031_v55 }
 0x398   :  { %v1071_v8 = vmul.f32 %v1069_v27, %v1061_v13  ;;  %v1088_v57 = vadd.f32 %v1080_v17, %v1070_v33 }
 0x399   :  { %1517 = vrsqrt.f32 %v1048_v29  ;;  %v1049_v43 = vadd.f32 1e-05, %v1041_v32 }
 0x39a   :  { %v1089_v49 = vadd.f32 %v1081_v41, %v1071_v8 }
 0x39b   :  { %v1514_v37 = vpop.eup %1513  ;;  %1519 = vrsqrt.f32 %v1049_v43 }
 0x39c   :  { %v1033_v5 = vpop.xlane.xlu1 %1032  ;;  %v1062_v24 = vmul.f32 %v1514_v37, %v2209_v19  ;;  %v1273_v46 = vpack.c.bf16 %v1089_v49, %v1088_v57 }
 0x39d   :  { %v1042_v0 = vmul.f32 0.0078125, %v1033_v5 }
 0x39e   :  { %v1035_v9 = vpop.xlane.xlu0 %1034  ;;  %1274 = vst [vmem:[#allocation12] sm:$0xff] %v1273_v46   ;;  %v1072_v61 = vmul.f32 %v1069_v27, %v1062_v24 }
 0x39f   :  { %v1516_v44 = vpop.eup %1515  ;;  %v1050_v50 = vadd.f32 1e-05, %v1042_v0  ;;  %v1043_v18 = vmul.f32 0.0078125, %v1035_v9 }
 0x3a0   :  { %v1063_v21 = vmul.f32 %v1516_v44, %v2214_v45  ;;  %v1090_v14 = vadd.f32 %v1082_v52, %v1072_v61  ;;  %v1084_v45 = vmul.f32 %v1079_v10, %v2194_v1 }
 0x3a1   :  { %1521 = vrsqrt.f32 %v1050_v50  ;;  %v1051_v58 = vadd.f32 1e-05, %v1043_v18 }
 0x3a2   :  { %v1073_v48 = vmul.f32 %v1069_v27, %v1063_v21 }
 0x3a3   :  { %v1518_v16 = vpop.eup %1517  ;;  %1523 = vrsqrt.f32 %v1051_v58 }
 0x3a4   :  { %v1064_v19 = vmul.f32 %v1518_v16, %v2219_v30  ;;  %v1091_v20 = vadd.f32 %v1083_v60, %v1073_v48 }
 0x3a5   :  { %v1520_v34 = vpop.eup %1519 }
 0x3a6   :  { %v1065_v53 = vmul.f32 %v1520_v34, %v2222_v47  ;;  %v1074_v3 = vmul.f32 %v1069_v27, %v1064_v19  ;;  %v1278_v7 = vpack.c.bf16 %v1091_v20, %v1090_v14  ;;  %v1086_v47 = vmul.f32 %v1079_v10, %v2200_v4 }
 0x3a8   :  { %v1075_v28 = vmul.f32 %v1069_v27, %v1065_v53  ;;  %1299 = vst [vmem:[#allocation12 + $0x8] sm:$0xff] %v1278_v7   ;;  %v1092_v39 = vadd.f32 %v1084_v45, %v1074_v3 }
 0x3aa   :  { %v1093_v15 = vadd.f32 %v1085_v31, %v1075_v28 }
 0x3ab   :  { %v1522_v63 = vpop.eup %1521 }
 0x3ac   :  { %v1066_v51 = vmul.f32 %v1522_v63, %v2229_v62  ;;  %v1283_v6 = vpack.c.bf16 %v1093_v15, %v1092_v39 }
 0x3ad   :  { %v1524_v30 = vpop.eup %1523 }
 0x3ae   :  { %v1067_v12 = vmul.f32 %v1524_v30, %v2232_v42  ;;  %v1076_v25 = vmul.f32 %v1069_v27, %v1066_v51  ;;  %1300 = vst [vmem:[#allocation12 + $0x10] sm:$0xff] %v1283_v6  }
 0x3b0   :  { %v1077_v1 = vmul.f32 %v1069_v27, %v1067_v12  ;;  %v1094_v2 = vadd.f32 %v1086_v47, %v1076_v25 }
 0x3b2   :  { %v1095_v40 = vadd.f32 %v1087_v38, %v1077_v1 }
 0x3b4   :  { %v1288_v22 = vpack.c.bf16 %v1095_v40, %v1094_v2 }
 0x3b6   :  { %1301 = vst [vmem:[#allocation12 + $0x18] sm:$0xff] %v1288_v22  }
 0x3b7   :  { %1636 = shalt.err (!%p1633_p13)
}
 0x3b8   :  { %s1637_s25 = scalar_lea.hbm %s2276_s9, 512 }
 0x3b9   :  { %p1638_p0 = scmp.ne.s32.totalorder %s2276_s9, %s1637_s25  ;;  %p1641_p1 = scmp.lt.u32.totalorder %s1637_s25, %s2276_s9 }
 0x3bb   :  { %p1643_p2 = pnand %p1641_p1, %p1638_p0 }
 0x3bd   :  { %1646 = shalt.err (!%p1643_p2)
}
 0x3be   :  { %1147 = dma.vmem_to_hbm [thread:$0]  %s1142_s20, 512, %s2276_s9, [#allocation4], %s1658_s0, %s1658_s0, %s1659_s22  }
 0x3bf   :  { %1655 = dma.done.wait [#allocation4], 512  }
 0x3c0   :  { %1656 = vsyncadd [#allocation4], 4294966784 }
 0x3c1   :  { %1151 = vsyncpa [#allocation3], 1 }
 0x3c2   :  { %1152 = vsyncpa [#allocation8], 1 }
 0x3c3   :  { %1153 = vsyncpa [#allocation11], 1 }
 0x3c4   :  { %1154 = vsyncpa [#allocation4], 1 }
 0x3c5   :  { %1155 = vsyncpa [#allocation5], 1 }

</bundles_post_ra>
